<compile_context>
chip_gen: v5e
topology: v5e:2x2
jax: 0.10.0
libtpu: 0.0.40
codegen_flags: <defaults>
</compile_context>

<pallas_src>
import math
import functools

import jax
import jax.numpy as jnp
from jax import lax
from jax.experimental import pallas as pl
from jax.experimental.pallas import tpu as pltpu

# ----------------------------- model dims -----------------------------------
B = 2        # batch
S = 8        # target sequence length
M = 8        # memory (source) sequence length
D = 32       # d_model
H = 4        # heads
DK = D // H  # per-head dim
DFF = 64     # feed-forward hidden dim
LN_EPS = 1e-6
NEG_INF = -1e9   # mirrors PyTorch masked_fill(mask == 0, -1e9)


# ----------------------------- fused kernel ----------------------------------
def _layer_norm(y, g, b):
    mean = jnp.mean(y, axis=-1, keepdims=True)
    var = jnp.mean((y - mean) ** 2, axis=-1, keepdims=True)
    return (y - mean) * lax.rsqrt(var + LN_EPS) * g + b


def decoder_layer_kernel(x_ref, mem_ref, mask_ref,
                         wq_ref, bq_ref, wkv_ref, bkv_ref, wo_ref, bo_ref,
                         g1_ref, bt1_ref,
                         w1_ref, b1_ref, w2_ref, b2_ref,
                         g2_ref, bt2_ref,
                         o_ref):
    """Whole decoder layer (enc-attn sublayer + FFN sublayer) on one block.

    x_ref   : (BB*S, D) flattened query rows (also the residual source)
    mem_ref : (BB*M, D) flattened memory rows (keys / values source)
    mask_ref: (BB, S, M) memory padding mask, 1.0 = keep
    """
    bb, s, m = mask_ref.shape
    d = x_ref.shape[1]

    xf = x_ref[...].astype(jnp.float32)          # (BB*S, D)
    mf = mem_ref[...].astype(jnp.float32)        # (BB*M, D)

    # Fused projections: one matmul for Q, one for packed K|V.
    q = jnp.dot(xf, wq_ref[...], preferred_element_type=jnp.float32) + bq_ref[...]
    kv = jnp.dot(mf, wkv_ref[...], preferred_element_type=jnp.float32) + bkv_ref[...]
    k = kv[:, :d]
    v = kv[:, d:]

    wo = wo_ref[...]
    scale = 1.0 / math.sqrt(d // H)

    # Multi-head attention; heads accumulate directly into the output
    # projection (ctx += head @ Wo[head_rows]) so no concat buffer is needed.
    ctx_blocks = []
    for b in range(bb):                       # static, BB in {1, 2}
        qb = q[b * s:(b + 1) * s, :]          # (S, D)  aligned row slices
        kb = k[b * m:(b + 1) * m, :]          # (M, D)
        vb = v[b * m:(b + 1) * m, :]          # (M, D)
        bias = jnp.where(mask_ref[b] > 0, 0.0, NEG_INF).astype(jnp.float32)  # (S, M)

        ctx = jnp.zeros((s, d), jnp.float32)
        for h in range(H):                    # static, H = 4
            cs = slice(h * DK, (h + 1) * DK)
            # scores = Qh @ Kh^T (contract DK axis of both)
            scores = lax.dot_general(
                qb[:, cs], kb[:, cs], (((1,), (1,)), ((), ())),
                preferred_element_type=jnp.float32) * scale + bias
            scores = scores - jnp.max(scores, axis=-1, keepdims=True)
            p = jnp.exp(scores)
            p = p * pl.reciprocal(jnp.sum(p, axis=-1, keepdims=True), approx=True)
            head = jnp.dot(p, vb[:, cs], preferred_element_type=jnp.float32)   # (S, DK)
            ctx = ctx + jnp.dot(head, wo[cs, :], preferred_element_type=jnp.float32)
        ctx_blocks.append(ctx)

    attn = ctx_blocks[0] if bb == 1 else jnp.concatenate(ctx_blocks, axis=0)   # (BB*S, D)

    # residual + LayerNorm (attention sublayer)
    y1 = _layer_norm(attn + bo_ref[...] + xf, g1_ref[...], bt1_ref[...])

    # position-wise FFN + residual + LayerNorm
    hid = jnp.maximum(
        jnp.dot(y1, w1_ref[...], preferred_element_type=jnp.float32) + b1_ref[...], 0.0)
    y2 = jnp.dot(hid, w2_ref[...], preferred_element_type=jnp.float32) + b2_ref[...] + y1
    o_ref[...] = _layer_norm(y2, g2_ref[...], bt2_ref[...]).astype(o_ref.dtype)


# ----------------------------- wrapper ---------------------------------------
def _const_spec(shape):
    nd = len(shape)
    return pl.BlockSpec(shape, lambda b, _nd=nd: (0,) * _nd)


def decoder_layer_fused(memory, x, mem_mask, enc_p, ffn_p, *, grid_b=1):
    """memory:(B,M,D)  x:(B,S,D)  mem_mask:(B,S,M)  ->  (B,S,D)."""
    wq, bq, wk, bk, wv, bv, wo, bo, g1, bt1 = enc_p
    w1, b1, w2, b2, g2, bt2 = ffn_p

    bsz, s, d = x.shape
    m = memory.shape[1]
    assert bsz % grid_b == 0
    bb = bsz // grid_b

    # Flatten batch outside the kernel (free layout plumbing) and pack K|V.
    x2 = x.reshape(bsz * s, d)
    mem2 = memory.reshape(bsz * m, d)
    wkv = jnp.concatenate([wk, wv], axis=1)      # (D, 2D)
    bkv = jnp.concatenate([bk, bv], axis=1)      # (1, 2D)

    def row_spec(rows, cols):
        return pl.BlockSpec((rows, cols), lambda b: (b, 0))

    out_flat = pl.pallas_call(
        decoder_layer_kernel,
        out_shape=jax.ShapeDtypeStruct((bsz * s, d), jnp.float32),
        grid=(grid_b,),
        in_specs=[
            row_spec(bb * s, d),                              # x rows
            row_spec(bb * m, d),                              # memory rows
            pl.BlockSpec((bb, s, m), lambda b: (b, 0, 0)),    # mem_mask
            _const_spec(wq.shape), _const_spec(bq.shape),     # Wq, bq
            _const_spec(wkv.shape), _const_spec(bkv.shape),   # Wk|Wv, bk|bv
            _const_spec(wo.shape), _const_spec(bo.shape),     # Wo, bo
            _const_spec(g1.shape), _const_spec(bt1.shape),    # LN1 gamma, beta
            _const_spec(w1.shape), _const_spec(b1.shape),     # FFN W1, b1
            _const_spec(w2.shape), _const_spec(b2.shape),     # FFN W2, b2
            _const_spec(g2.shape), _const_spec(bt2.shape),    # LN2 gamma, beta
        ],
        out_specs=row_spec(bb * s, d),
        compiler_params=pltpu.CompilerParams(
            dimension_semantics=("parallel",)),
    )(x2, mem2, mem_mask,
      wq, bq, wkv, bkv, wo, bo, g1, bt1,
      w1, b1, w2, b2, g2, bt2)
    return out_flat.reshape(bsz, s, d)


@functools.partial(jax.jit, static_argnames=("grid_b",))
def decoder_layer(memory, x, mem_mask, slf_mask, slf_p, enc_p, ffn_p, *, grid_b=1):
    # TODO(synk): dropout (drop_rate=0.1) is identity in eval mode; not implemented.
    # The reference forward computes slf_attn(x,x,x,slf_mask) and immediately
    # overwrites it, so the returned value never depends on it -> skipped here.
    del slf_mask, slf_p
    return decoder_layer_fused(memory, x, mem_mask, enc_p, ffn_p, grid_b=grid_b)


def _batch_parallel_cores(batch):
    """v7x has 2 TensorCores per chip; shard the batch grid across them there."""
    try:
        kind = jax.devices()[0].device_kind.lower()
    except Exception:
        return 1
    cores = 2 if "v7" in kind else 1
    return cores if batch % cores == 0 else 1


# ----------------------------- parameter init --------------------------------
def init_mha_params(key):
    ks = jax.random.split(key, 4)
    scale = 0.02
    wq = scale * jax.random.normal(ks[0], (D, D), jnp.float32)
    wk = scale * jax.random.normal(ks[1], (D, D), jnp.float32)
    wv = scale * jax.random.normal(ks[2], (D, D), jnp.float32)
    wo = scale * jax.random.normal(ks[3], (D, D), jnp.float32)
    zeros_d = jnp.zeros((1, D), jnp.float32)
    gamma = jnp.ones((1, D), jnp.float32)
    return (wq, zeros_d, wk, zeros_d, wv, zeros_d, wo, zeros_d, gamma, zeros_d)


def init_ffn_params(key):
    k1, k2 = jax.random.split(key)
    scale = 0.02
    w1 = scale * jax.random.normal(k1, (D, DFF), jnp.float32)
    w2 = scale * jax.random.normal(k2, (DFF, D), jnp.float32)
    return (w1, jnp.zeros((1, DFF), jnp.float32),
            w2, jnp.zeros((1, D), jnp.float32),
            jnp.ones((1, D), jnp.float32), jnp.zeros((1, D), jnp.float32))


# ----------------------------- main -------------------------------------------
if __name__ == "__main__":
    key = jax.random.PRNGKey(0)
    k_mem, k_x, k_slf, k_enc, k_ffn = jax.random.split(key, 5)

    memory = jax.random.normal(k_mem, (B, M, D), jnp.float32)
    x = jax.random.normal(k_x, (B, S, D), jnp.float32)

    # self-attention mask: causal, 1.0 = keep (accepted for interface parity)
    slf_mask = jnp.tril(jnp.ones((S, S), jnp.float32))[None].repeat(B, axis=0)
    # memory mask: batch 1 has its last two memory positions padded out
    mem_mask = jnp.ones((B, S, M), jnp.float32)
    mem_mask = mem_mask.at[1, :, M - 2:].set(0.0)

    slf_params = init_mha_params(k_slf)
    enc_params = init_mha_params(k_enc)
    ffn_params = init_ffn_params(k_ffn)

    grid_b = _batch_parallel_cores(B)
    out = decoder_layer(memory, x, mem_mask, slf_mask,
                        slf_params, enc_params, ffn_params, grid_b=grid_b)
    jax.block_until_ready(out)
    assert out.shape == (B, S, D) and out.dtype == jnp.float32
    assert bool(jnp.all(jnp.isfinite(out)))
    print("KERNEL_OK")
</pallas_src>

<mosaic_0001>
module attributes {stable_mosaic.version = 11 : i64} {
  func.func @decoder_layer_kernel(%arg0: i32, %arg1: memref<16x32xf32, #tpu.memory_space<vmem>>, %arg2: memref<16x32xf32, #tpu.memory_space<vmem>>, %arg3: memref<2x8x8xf32, #tpu.memory_space<vmem>>, %arg4: memref<32x32xf32, #tpu.memory_space<vmem>>, %arg5: memref<1x32xf32, #tpu.memory_space<vmem>>, %arg6: memref<32x64xf32, #tpu.memory_space<vmem>>, %arg7: memref<1x64xf32, #tpu.memory_space<vmem>>, %arg8: memref<32x32xf32, #tpu.memory_space<vmem>>, %arg9: memref<1x32xf32, #tpu.memory_space<vmem>>, %arg10: memref<1x32xf32, #tpu.memory_space<vmem>>, %arg11: memref<1x32xf32, #tpu.memory_space<vmem>>, %arg12: memref<32x64xf32, #tpu.memory_space<vmem>>, %arg13: memref<1x64xf32, #tpu.memory_space<vmem>>, %arg14: memref<64x32xf32, #tpu.memory_space<vmem>>, %arg15: memref<1x32xf32, #tpu.memory_space<vmem>>, %arg16: memref<1x32xf32, #tpu.memory_space<vmem>>, %arg17: memref<1x32xf32, #tpu.memory_space<vmem>>, %arg18: memref<16x32xf32, #tpu.memory_space<vmem>>) attributes {dimension_semantics = [#tpu.dimension_semantics<parallel>], iteration_bounds = array<i64: 1>, scalar_prefetch = 0 : i64, scratch_operands = 0 : i64, tpu.core_type = #tpu.core_type<tc>, window_params = [{transform_indices = @transform_0, window_bounds = array<i64: 16, 32>}, {transform_indices = @transform_1, window_bounds = array<i64: 16, 32>}, {transform_indices = @transform_2, window_bounds = array<i64: 2, 8, 8>}, {pipeline_mode = #tpu.pipeline_mode<synchronous>, transform_indices = @transform_3, window_bounds = array<i64: 32, 32>}, {pipeline_mode = #tpu.pipeline_mode<synchronous>, transform_indices = @transform_4, window_bounds = array<i64: 1, 32>}, {pipeline_mode = #tpu.pipeline_mode<synchronous>, transform_indices = @transform_5, window_bounds = array<i64: 32, 64>}, {pipeline_mode = #tpu.pipeline_mode<synchronous>, transform_indices = @transform_6, window_bounds = array<i64: 1, 64>}, {pipeline_mode = #tpu.pipeline_mode<synchronous>, transform_indices = @transform_7, window_bounds = array<i64: 32, 32>}, {pipeline_mode = #tpu.pipeline_mode<synchronous>, transform_indices = @transform_8, window_bounds = array<i64: 1, 32>}, {pipeline_mode = #tpu.pipeline_mode<synchronous>, transform_indices = @transform_9, window_bounds = array<i64: 1, 32>}, {pipeline_mode = #tpu.pipeline_mode<synchronous>, transform_indices = @transform_10, window_bounds = array<i64: 1, 32>}, {pipeline_mode = #tpu.pipeline_mode<synchronous>, transform_indices = @transform_11, window_bounds = array<i64: 32, 64>}, {pipeline_mode = #tpu.pipeline_mode<synchronous>, transform_indices = @transform_12, window_bounds = array<i64: 1, 64>}, {pipeline_mode = #tpu.pipeline_mode<synchronous>, transform_indices = @transform_13, window_bounds = array<i64: 64, 32>}, {pipeline_mode = #tpu.pipeline_mode<synchronous>, transform_indices = @transform_14, window_bounds = array<i64: 1, 32>}, {pipeline_mode = #tpu.pipeline_mode<synchronous>, transform_indices = @transform_15, window_bounds = array<i64: 1, 32>}, {pipeline_mode = #tpu.pipeline_mode<synchronous>, transform_indices = @transform_16, window_bounds = array<i64: 1, 32>}, {transform_indices = @transform_17, window_bounds = array<i64: 16, 32>}]} {
    %c0 = arith.constant 0 : index
    %c0_0 = arith.constant 0 : index
    %0 = vector.load %arg1[%c0, %c0_0] : memref<16x32xf32, #tpu.memory_space<vmem>>, vector<16x32xf32>
    %c0_1 = arith.constant 0 : index
    %c0_2 = arith.constant 0 : index
    %1 = vector.load %arg2[%c0_1, %c0_2] : memref<16x32xf32, #tpu.memory_space<vmem>>, vector<16x32xf32>
    %c0_3 = arith.constant 0 : index
    %c0_4 = arith.constant 0 : index
    %2 = vector.load %arg4[%c0_3, %c0_4] : memref<32x32xf32, #tpu.memory_space<vmem>>, vector<32x32xf32>
    %cst = arith.constant dense<0.000000e+00> : vector<16x32xf32>
    %3 = tpu.matmul %0, %2, %cst {dimension_numbers = #tpu.dot_dimension_numbers<[1], [0], [0], [1], [0, 0, 1, 1], [], []>} : vector<16x32xf32>, vector<32x32xf32>, vector<16x32xf32> -> vector<16x32xf32>
    %c0_5 = arith.constant 0 : index
    %c0_6 = arith.constant 0 : index
    %4 = vector.load %arg5[%c0_5, %c0_6] : memref<1x32xf32, #tpu.memory_space<vmem>>, vector<1x32xf32>
    %5 = vector.broadcast %4 : vector<1x32xf32> to vector<16x32xf32>
    %6 = arith.addf %3, %5 : vector<16x32xf32>
    %c0_7 = arith.constant 0 : index
    %c0_8 = arith.constant 0 : index
    %7 = vector.load %arg6[%c0_7, %c0_8] : memref<32x64xf32, #tpu.memory_space<vmem>>, vector<32x64xf32>
    %cst_9 = arith.constant dense<0.000000e+00> : vector<16x64xf32>
    %8 = tpu.matmul %1, %7, %cst_9 {dimension_numbers = #tpu.dot_dimension_numbers<[1], [0], [0], [1], [0, 0, 1, 1], [], []>} : vector<16x32xf32>, vector<32x64xf32>, vector<16x64xf32> -> vector<16x64xf32>
    %c0_10 = arith.constant 0 : index
    %c0_11 = arith.constant 0 : index
    %9 = vector.load %arg7[%c0_10, %c0_11] : memref<1x64xf32, #tpu.memory_space<vmem>>, vector<1x64xf32>
    %10 = vector.broadcast %9 : vector<1x64xf32> to vector<16x64xf32>
    %11 = arith.addf %8, %10 : vector<16x64xf32>
    %12 = vector.extract_strided_slice %11 {offsets = [0, 0], sizes = [16, 32], strides = [1, 1]} : vector<16x64xf32> to vector<16x32xf32>
    %13 = vector.extract_strided_slice %11 {offsets = [0, 32], sizes = [16, 32], strides = [1, 1]} : vector<16x64xf32> to vector<16x32xf32>
    %c0_12 = arith.constant 0 : index
    %c0_13 = arith.constant 0 : index
    %14 = vector.load %arg8[%c0_12, %c0_13] : memref<32x32xf32, #tpu.memory_space<vmem>>, vector<32x32xf32>
    %15 = vector.extract_strided_slice %6 {offsets = [0, 0], sizes = [8, 32], strides = [1, 1]} : vector<16x32xf32> to vector<8x32xf32>
    %16 = vector.extract_strided_slice %12 {offsets = [0, 0], sizes = [8, 32], strides = [1, 1]} : vector<16x32xf32> to vector<8x32xf32>
    %17 = vector.extract_strided_slice %13 {offsets = [0, 0], sizes = [8, 32], strides = [1, 1]} : vector<16x32xf32> to vector<8x32xf32>
    %c0_14 = arith.constant 0 : index
    %c0_15 = arith.constant 0 : index
    %c0_16 = arith.constant 0 : index
    %18 = vector.load %arg3[%c0_14, %c0_15, %c0_16] : memref<2x8x8xf32, #tpu.memory_space<vmem>>, vector<1x8x8xf32>
    %19 = vector.shape_cast %18 : vector<1x8x8xf32> to vector<8x8xf32>
    %cst_17 = arith.constant 0.000000e+00 : f32
    %20 = vector.broadcast %cst_17 : f32 to vector<8x8xf32>
    %21 = arith.cmpf ogt, %19, %20 : vector<8x8xf32>
    %cst_18 = arith.constant 0.000000e+00 : f32
    %cst_19 = arith.constant -1.000000e+09 : f32
    %22 = vector.broadcast %cst_18 : f32 to vector<8x8xf32>
    %23 = vector.broadcast %cst_19 : f32 to vector<8x8xf32>
    %24 = arith.select %21, %22, %23 : vector<8x8xi1>, vector<8x8xf32>
    %cst_20 = arith.constant 0.000000e+00 : f32
    %25 = vector.broadcast %cst_20 : f32 to vector<8x32xf32>
    %26 = vector.extract_strided_slice %15 {offsets = [0, 0], sizes = [8, 8], strides = [1, 1]} : vector<8x32xf32> to vector<8x8xf32>
    %27 = vector.extract_strided_slice %16 {offsets = [0, 0], sizes = [8, 8], strides = [1, 1]} : vector<8x32xf32> to vector<8x8xf32>
    %cst_21 = arith.constant dense<0.000000e+00> : vector<8x8xf32>
    %28 = tpu.matmul %26, %27, %cst_21 {dimension_numbers = #tpu.dot_dimension_numbers<[1], [1], [0], [0], [0, 0, 1, 0], [], []>} : vector<8x8xf32>, vector<8x8xf32>, vector<8x8xf32> -> vector<8x8xf32>
    %cst_22 = arith.constant 0.353553385 : f32
    %29 = vector.broadcast %cst_22 : f32 to vector<8x8xf32>
    %30 = arith.mulf %28, %29 : vector<8x8xf32>
    %31 = arith.addf %30, %24 : vector<8x8xf32>
    %cst_23 = arith.constant dense<0xFF800000> : vector<8xf32>
    %32 = vector.multi_reduction <maximumf>, %31, %cst_23 [1] : vector<8x8xf32> to vector<8xf32>
    %33 = vector.shape_cast %32 : vector<8xf32> to vector<8x1xf32>
    %34 = vector.broadcast %33 : vector<8x1xf32> to vector<8x8xf32>
    %35 = arith.subf %31, %34 : vector<8x8xf32>
    %36 = math.exp %35 : vector<8x8xf32>
    %cst_24 = arith.constant dense<0.000000e+00> : vector<8xf32>
    %37 = vector.multi_reduction <add>, %36, %cst_24 [1] : vector<8x8xf32> to vector<8xf32>
    %38 = vector.shape_cast %37 : vector<8xf32> to vector<8x1xf32>
    %39 = tpu.reciprocal %38 {approx = true} : vector<8x1xf32> -> vector<8x1xf32>
    %40 = vector.broadcast %39 : vector<8x1xf32> to vector<8x8xf32>
    %41 = arith.mulf %36, %40 : vector<8x8xf32>
    %42 = vector.extract_strided_slice %17 {offsets = [0, 0], sizes = [8, 8], strides = [1, 1]} : vector<8x32xf32> to vector<8x8xf32>
    %cst_25 = arith.constant dense<0.000000e+00> : vector<8x8xf32>
    %43 = tpu.matmul %41, %42, %cst_25 {dimension_numbers = #tpu.dot_dimension_numbers<[1], [0], [0], [1], [0, 0, 1, 1], [], []>} : vector<8x8xf32>, vector<8x8xf32>, vector<8x8xf32> -> vector<8x8xf32>
    %44 = vector.extract_strided_slice %14 {offsets = [0, 0], sizes = [8, 32], strides = [1, 1]} : vector<32x32xf32> to vector<8x32xf32>
    %cst_26 = arith.constant dense<0.000000e+00> : vector<8x32xf32>
    %45 = tpu.matmul %43, %44, %cst_26 {dimension_numbers = #tpu.dot_dimension_numbers<[1], [0], [0], [1], [0, 0, 1, 1], [], []>} : vector<8x8xf32>, vector<8x32xf32>, vector<8x32xf32> -> vector<8x32xf32>
    %46 = arith.addf %25, %45 : vector<8x32xf32>
    %47 = vector.extract_strided_slice %15 {offsets = [0, 8], sizes = [8, 8], strides = [1, 1]} : vector<8x32xf32> to vector<8x8xf32>
    %48 = vector.extract_strided_slice %16 {offsets = [0, 8], sizes = [8, 8], strides = [1, 1]} : vector<8x32xf32> to vector<8x8xf32>
    %cst_27 = arith.constant dense<0.000000e+00> : vector<8x8xf32>
    %49 = tpu.matmul %47, %48, %cst_27 {dimension_numbers = #tpu.dot_dimension_numbers<[1], [1], [0], [0], [0, 0, 1, 0], [], []>} : vector<8x8xf32>, vector<8x8xf32>, vector<8x8xf32> -> vector<8x8xf32>
    %cst_28 = arith.constant 0.353553385 : f32
    %50 = vector.broadcast %cst_28 : f32 to vector<8x8xf32>
    %51 = arith.mulf %49, %50 : vector<8x8xf32>
    %52 = arith.addf %51, %24 : vector<8x8xf32>
    %cst_29 = arith.constant dense<0xFF800000> : vector<8xf32>
    %53 = vector.multi_reduction <maximumf>, %52, %cst_29 [1] : vector<8x8xf32> to vector<8xf32>
    %54 = vector.shape_cast %53 : vector<8xf32> to vector<8x1xf32>
    %55 = vector.broadcast %54 : vector<8x1xf32> to vector<8x8xf32>
    %56 = arith.subf %52, %55 : vector<8x8xf32>
    %57 = math.exp %56 : vector<8x8xf32>
    %cst_30 = arith.constant dense<0.000000e+00> : vector<8xf32>
    %58 = vector.multi_reduction <add>, %57, %cst_30 [1] : vector<8x8xf32> to vector<8xf32>
    %59 = vector.shape_cast %58 : vector<8xf32> to vector<8x1xf32>
    %60 = tpu.reciprocal %59 {approx = true} : vector<8x1xf32> -> vector<8x1xf32>
    %61 = vector.broadcast %60 : vector<8x1xf32> to vector<8x8xf32>
    %62 = arith.mulf %57, %61 : vector<8x8xf32>
    %63 = vector.extract_strided_slice %17 {offsets = [0, 8], sizes = [8, 8], strides = [1, 1]} : vector<8x32xf32> to vector<8x8xf32>
    %cst_31 = arith.constant dense<0.000000e+00> : vector<8x8xf32>
    %64 = tpu.matmul %62, %63, %cst_31 {dimension_numbers = #tpu.dot_dimension_numbers<[1], [0], [0], [1], [0, 0, 1, 1], [], []>} : vector<8x8xf32>, vector<8x8xf32>, vector<8x8xf32> -> vector<8x8xf32>
    %65 = vector.extract_strided_slice %14 {offsets = [8, 0], sizes = [8, 32], strides = [1, 1]} : vector<32x32xf32> to vector<8x32xf32>
    %cst_32 = arith.constant dense<0.000000e+00> : vector<8x32xf32>
    %66 = tpu.matmul %64, %65, %cst_32 {dimension_numbers = #tpu.dot_dimension_numbers<[1], [0], [0], [1], [0, 0, 1, 1], [], []>} : vector<8x8xf32>, vector<8x32xf32>, vector<8x32xf32> -> vector<8x32xf32>
    %67 = arith.addf %46, %66 : vector<8x32xf32>
    %68 = vector.extract_strided_slice %15 {offsets = [0, 16], sizes = [8, 8], strides = [1, 1]} : vector<8x32xf32> to vector<8x8xf32>
    %69 = vector.extract_strided_slice %16 {offsets = [0, 16], sizes = [8, 8], strides = [1, 1]} : vector<8x32xf32> to vector<8x8xf32>
    %cst_33 = arith.constant dense<0.000000e+00> : vector<8x8xf32>
    %70 = tpu.matmul %68, %69, %cst_33 {dimension_numbers = #tpu.dot_dimension_numbers<[1], [1], [0], [0], [0, 0, 1, 0], [], []>} : vector<8x8xf32>, vector<8x8xf32>, vector<8x8xf32> -> vector<8x8xf32>
    %cst_34 = arith.constant 0.353553385 : f32
    %71 = vector.broadcast %cst_34 : f32 to vector<8x8xf32>
    %72 = arith.mulf %70, %71 : vector<8x8xf32>
    %73 = arith.addf %72, %24 : vector<8x8xf32>
    %cst_35 = arith.constant dense<0xFF800000> : vector<8xf32>
    %74 = vector.multi_reduction <maximumf>, %73, %cst_35 [1] : vector<8x8xf32> to vector<8xf32>
    %75 = vector.shape_cast %74 : vector<8xf32> to vector<8x1xf32>
    %76 = vector.broadcast %75 : vector<8x1xf32> to vector<8x8xf32>
    %77 = arith.subf %73, %76 : vector<8x8xf32>
    %78 = math.exp %77 : vector<8x8xf32>
    %cst_36 = arith.constant dense<0.000000e+00> : vector<8xf32>
    %79 = vector.multi_reduction <add>, %78, %cst_36 [1] : vector<8x8xf32> to vector<8xf32>
    %80 = vector.shape_cast %79 : vector<8xf32> to vector<8x1xf32>
    %81 = tpu.reciprocal %80 {approx = true} : vector<8x1xf32> -> vector<8x1xf32>
    %82 = vector.broadcast %81 : vector<8x1xf32> to vector<8x8xf32>
    %83 = arith.mulf %78, %82 : vector<8x8xf32>
    %84 = vector.extract_strided_slice %17 {offsets = [0, 16], sizes = [8, 8], strides = [1, 1]} : vector<8x32xf32> to vector<8x8xf32>
    %cst_37 = arith.constant dense<0.000000e+00> : vector<8x8xf32>
    %85 = tpu.matmul %83, %84, %cst_37 {dimension_numbers = #tpu.dot_dimension_numbers<[1], [0], [0], [1], [0, 0, 1, 1], [], []>} : vector<8x8xf32>, vector<8x8xf32>, vector<8x8xf32> -> vector<8x8xf32>
    %86 = vector.extract_strided_slice %14 {offsets = [16, 0], sizes = [8, 32], strides = [1, 1]} : vector<32x32xf32> to vector<8x32xf32>
    %cst_38 = arith.constant dense<0.000000e+00> : vector<8x32xf32>
    %87 = tpu.matmul %85, %86, %cst_38 {dimension_numbers = #tpu.dot_dimension_numbers<[1], [0], [0], [1], [0, 0, 1, 1], [], []>} : vector<8x8xf32>, vector<8x32xf32>, vector<8x32xf32> -> vector<8x32xf32>
    %88 = arith.addf %67, %87 : vector<8x32xf32>
    %89 = vector.extract_strided_slice %15 {offsets = [0, 24], sizes = [8, 8], strides = [1, 1]} : vector<8x32xf32> to vector<8x8xf32>
    %90 = vector.extract_strided_slice %16 {offsets = [0, 24], sizes = [8, 8], strides = [1, 1]} : vector<8x32xf32> to vector<8x8xf32>
    %cst_39 = arith.constant dense<0.000000e+00> : vector<8x8xf32>
    %91 = tpu.matmul %89, %90, %cst_39 {dimension_numbers = #tpu.dot_dimension_numbers<[1], [1], [0], [0], [0, 0, 1, 0], [], []>} : vector<8x8xf32>, vector<8x8xf32>, vector<8x8xf32> -> vector<8x8xf32>
    %cst_40 = arith.constant 0.353553385 : f32
    %92 = vector.broadcast %cst_40 : f32 to vector<8x8xf32>
    %93 = arith.mulf %91, %92 : vector<8x8xf32>
    %94 = arith.addf %93, %24 : vector<8x8xf32>
    %cst_41 = arith.constant dense<0xFF800000> : vector<8xf32>
    %95 = vector.multi_reduction <maximumf>, %94, %cst_41 [1] : vector<8x8xf32> to vector<8xf32>
    %96 = vector.shape_cast %95 : vector<8xf32> to vector<8x1xf32>
    %97 = vector.broadcast %96 : vector<8x1xf32> to vector<8x8xf32>
    %98 = arith.subf %94, %97 : vector<8x8xf32>
    %99 = math.exp %98 : vector<8x8xf32>
    %cst_42 = arith.constant dense<0.000000e+00> : vector<8xf32>
    %100 = vector.multi_reduction <add>, %99, %cst_42 [1] : vector<8x8xf32> to vector<8xf32>
    %101 = vector.shape_cast %100 : vector<8xf32> to vector<8x1xf32>
    %102 = tpu.reciprocal %101 {approx = true} : vector<8x1xf32> -> vector<8x1xf32>
    %103 = vector.broadcast %102 : vector<8x1xf32> to vector<8x8xf32>
    %104 = arith.mulf %99, %103 : vector<8x8xf32>
    %105 = vector.extract_strided_slice %17 {offsets = [0, 24], sizes = [8, 8], strides = [1, 1]} : vector<8x32xf32> to vector<8x8xf32>
    %cst_43 = arith.constant dense<0.000000e+00> : vector<8x8xf32>
    %106 = tpu.matmul %104, %105, %cst_43 {dimension_numbers = #tpu.dot_dimension_numbers<[1], [0], [0], [1], [0, 0, 1, 1], [], []>} : vector<8x8xf32>, vector<8x8xf32>, vector<8x8xf32> -> vector<8x8xf32>
    %107 = vector.extract_strided_slice %14 {offsets = [24, 0], sizes = [8, 32], strides = [1, 1]} : vector<32x32xf32> to vector<8x32xf32>
    %cst_44 = arith.constant dense<0.000000e+00> : vector<8x32xf32>
    %108 = tpu.matmul %106, %107, %cst_44 {dimension_numbers = #tpu.dot_dimension_numbers<[1], [0], [0], [1], [0, 0, 1, 1], [], []>} : vector<8x8xf32>, vector<8x32xf32>, vector<8x32xf32> -> vector<8x32xf32>
    %109 = arith.addf %88, %108 : vector<8x32xf32>
    %110 = vector.extract_strided_slice %6 {offsets = [8, 0], sizes = [8, 32], strides = [1, 1]} : vector<16x32xf32> to vector<8x32xf32>
    %111 = vector.extract_strided_slice %12 {offsets = [8, 0], sizes = [8, 32], strides = [1, 1]} : vector<16x32xf32> to vector<8x32xf32>
    %112 = vector.extract_strided_slice %13 {offsets = [8, 0], sizes = [8, 32], strides = [1, 1]} : vector<16x32xf32> to vector<8x32xf32>
    %c1 = arith.constant 1 : index
    %c0_45 = arith.constant 0 : index
    %c0_46 = arith.constant 0 : index
    %113 = vector.load %arg3[%c1, %c0_45, %c0_46] : memref<2x8x8xf32, #tpu.memory_space<vmem>>, vector<1x8x8xf32>
    %114 = vector.shape_cast %113 : vector<1x8x8xf32> to vector<8x8xf32>
    %cst_47 = arith.constant 0.000000e+00 : f32
    %115 = vector.broadcast %cst_47 : f32 to vector<8x8xf32>
    %116 = arith.cmpf ogt, %114, %115 : vector<8x8xf32>
    %cst_48 = arith.constant 0.000000e+00 : f32
    %cst_49 = arith.constant -1.000000e+09 : f32
    %117 = vector.broadcast %cst_48 : f32 to vector<8x8xf32>
    %118 = vector.broadcast %cst_49 : f32 to vector<8x8xf32>
    %119 = arith.select %116, %117, %118 : vector<8x8xi1>, vector<8x8xf32>
    %cst_50 = arith.constant 0.000000e+00 : f32
    %120 = vector.broadcast %cst_50 : f32 to vector<8x32xf32>
    %121 = vector.extract_strided_slice %110 {offsets = [0, 0], sizes = [8, 8], strides = [1, 1]} : vector<8x32xf32> to vector<8x8xf32>
    %122 = vector.extract_strided_slice %111 {offsets = [0, 0], sizes = [8, 8], strides = [1, 1]} : vector<8x32xf32> to vector<8x8xf32>
    %cst_51 = arith.constant dense<0.000000e+00> : vector<8x8xf32>
    %123 = tpu.matmul %121, %122, %cst_51 {dimension_numbers = #tpu.dot_dimension_numbers<[1], [1], [0], [0], [0, 0, 1, 0], [], []>} : vector<8x8xf32>, vector<8x8xf32>, vector<8x8xf32> -> vector<8x8xf32>
    %cst_52 = arith.constant 0.353553385 : f32
    %124 = vector.broadcast %cst_52 : f32 to vector<8x8xf32>
    %125 = arith.mulf %123, %124 : vector<8x8xf32>
    %126 = arith.addf %125, %119 : vector<8x8xf32>
    %cst_53 = arith.constant dense<0xFF800000> : vector<8xf32>
    %127 = vector.multi_reduction <maximumf>, %126, %cst_53 [1] : vector<8x8xf32> to vector<8xf32>
    %128 = vector.shape_cast %127 : vector<8xf32> to vector<8x1xf32>
    %129 = vector.broadcast %128 : vector<8x1xf32> to vector<8x8xf32>
    %130 = arith.subf %126, %129 : vector<8x8xf32>
    %131 = math.exp %130 : vector<8x8xf32>
    %cst_54 = arith.constant dense<0.000000e+00> : vector<8xf32>
    %132 = vector.multi_reduction <add>, %131, %cst_54 [1] : vector<8x8xf32> to vector<8xf32>
    %133 = vector.shape_cast %132 : vector<8xf32> to vector<8x1xf32>
    %134 = tpu.reciprocal %133 {approx = true} : vector<8x1xf32> -> vector<8x1xf32>
    %135 = vector.broadcast %134 : vector<8x1xf32> to vector<8x8xf32>
    %136 = arith.mulf %131, %135 : vector<8x8xf32>
    %137 = vector.extract_strided_slice %112 {offsets = [0, 0], sizes = [8, 8], strides = [1, 1]} : vector<8x32xf32> to vector<8x8xf32>
    %cst_55 = arith.constant dense<0.000000e+00> : vector<8x8xf32>
    %138 = tpu.matmul %136, %137, %cst_55 {dimension_numbers = #tpu.dot_dimension_numbers<[1], [0], [0], [1], [0, 0, 1, 1], [], []>} : vector<8x8xf32>, vector<8x8xf32>, vector<8x8xf32> -> vector<8x8xf32>
    %139 = vector.extract_strided_slice %14 {offsets = [0, 0], sizes = [8, 32], strides = [1, 1]} : vector<32x32xf32> to vector<8x32xf32>
    %cst_56 = arith.constant dense<0.000000e+00> : vector<8x32xf32>
    %140 = tpu.matmul %138, %139, %cst_56 {dimension_numbers = #tpu.dot_dimension_numbers<[1], [0], [0], [1], [0, 0, 1, 1], [], []>} : vector<8x8xf32>, vector<8x32xf32>, vector<8x32xf32> -> vector<8x32xf32>
    %141 = arith.addf %120, %140 : vector<8x32xf32>
    %142 = vector.extract_strided_slice %110 {offsets = [0, 8], sizes = [8, 8], strides = [1, 1]} : vector<8x32xf32> to vector<8x8xf32>
    %143 = vector.extract_strided_slice %111 {offsets = [0, 8], sizes = [8, 8], strides = [1, 1]} : vector<8x32xf32> to vector<8x8xf32>
    %cst_57 = arith.constant dense<0.000000e+00> : vector<8x8xf32>
    %144 = tpu.matmul %142, %143, %cst_57 {dimension_numbers = #tpu.dot_dimension_numbers<[1], [1], [0], [0], [0, 0, 1, 0], [], []>} : vector<8x8xf32>, vector<8x8xf32>, vector<8x8xf32> -> vector<8x8xf32>
    %cst_58 = arith.constant 0.353553385 : f32
    %145 = vector.broadcast %cst_58 : f32 to vector<8x8xf32>
    %146 = arith.mulf %144, %145 : vector<8x8xf32>
    %147 = arith.addf %146, %119 : vector<8x8xf32>
    %cst_59 = arith.constant dense<0xFF800000> : vector<8xf32>
    %148 = vector.multi_reduction <maximumf>, %147, %cst_59 [1] : vector<8x8xf32> to vector<8xf32>
    %149 = vector.shape_cast %148 : vector<8xf32> to vector<8x1xf32>
    %150 = vector.broadcast %149 : vector<8x1xf32> to vector<8x8xf32>
    %151 = arith.subf %147, %150 : vector<8x8xf32>
    %152 = math.exp %151 : vector<8x8xf32>
    %cst_60 = arith.constant dense<0.000000e+00> : vector<8xf32>
    %153 = vector.multi_reduction <add>, %152, %cst_60 [1] : vector<8x8xf32> to vector<8xf32>
    %154 = vector.shape_cast %153 : vector<8xf32> to vector<8x1xf32>
    %155 = tpu.reciprocal %154 {approx = true} : vector<8x1xf32> -> vector<8x1xf32>
    %156 = vector.broadcast %155 : vector<8x1xf32> to vector<8x8xf32>
    %157 = arith.mulf %152, %156 : vector<8x8xf32>
    %158 = vector.extract_strided_slice %112 {offsets = [0, 8], sizes = [8, 8], strides = [1, 1]} : vector<8x32xf32> to vector<8x8xf32>
    %cst_61 = arith.constant dense<0.000000e+00> : vector<8x8xf32>
    %159 = tpu.matmul %157, %158, %cst_61 {dimension_numbers = #tpu.dot_dimension_numbers<[1], [0], [0], [1], [0, 0, 1, 1], [], []>} : vector<8x8xf32>, vector<8x8xf32>, vector<8x8xf32> -> vector<8x8xf32>
    %160 = vector.extract_strided_slice %14 {offsets = [8, 0], sizes = [8, 32], strides = [1, 1]} : vector<32x32xf32> to vector<8x32xf32>
    %cst_62 = arith.constant dense<0.000000e+00> : vector<8x32xf32>
    %161 = tpu.matmul %159, %160, %cst_62 {dimension_numbers = #tpu.dot_dimension_numbers<[1], [0], [0], [1], [0, 0, 1, 1], [], []>} : vector<8x8xf32>, vector<8x32xf32>, vector<8x32xf32> -> vector<8x32xf32>
    %162 = arith.addf %141, %161 : vector<8x32xf32>
    %163 = vector.extract_strided_slice %110 {offsets = [0, 16], sizes = [8, 8], strides = [1, 1]} : vector<8x32xf32> to vector<8x8xf32>
    %164 = vector.extract_strided_slice %111 {offsets = [0, 16], sizes = [8, 8], strides = [1, 1]} : vector<8x32xf32> to vector<8x8xf32>
    %cst_63 = arith.constant dense<0.000000e+00> : vector<8x8xf32>
    %165 = tpu.matmul %163, %164, %cst_63 {dimension_numbers = #tpu.dot_dimension_numbers<[1], [1], [0], [0], [0, 0, 1, 0], [], []>} : vector<8x8xf32>, vector<8x8xf32>, vector<8x8xf32> -> vector<8x8xf32>
    %cst_64 = arith.constant 0.353553385 : f32
    %166 = vector.broadcast %cst_64 : f32 to vector<8x8xf32>
    %167 = arith.mulf %165, %166 : vector<8x8xf32>
    %168 = arith.addf %167, %119 : vector<8x8xf32>
    %cst_65 = arith.constant dense<0xFF800000> : vector<8xf32>
    %169 = vector.multi_reduction <maximumf>, %168, %cst_65 [1] : vector<8x8xf32> to vector<8xf32>
    %170 = vector.shape_cast %169 : vector<8xf32> to vector<8x1xf32>
    %171 = vector.broadcast %170 : vector<8x1xf32> to vector<8x8xf32>
    %172 = arith.subf %168, %171 : vector<8x8xf32>
    %173 = math.exp %172 : vector<8x8xf32>
    %cst_66 = arith.constant dense<0.000000e+00> : vector<8xf32>
    %174 = vector.multi_reduction <add>, %173, %cst_66 [1] : vector<8x8xf32> to vector<8xf32>
    %175 = vector.shape_cast %174 : vector<8xf32> to vector<8x1xf32>
    %176 = tpu.reciprocal %175 {approx = true} : vector<8x1xf32> -> vector<8x1xf32>
    %177 = vector.broadcast %176 : vector<8x1xf32> to vector<8x8xf32>
    %178 = arith.mulf %173, %177 : vector<8x8xf32>
    %179 = vector.extract_strided_slice %112 {offsets = [0, 16], sizes = [8, 8], strides = [1, 1]} : vector<8x32xf32> to vector<8x8xf32>
    %cst_67 = arith.constant dense<0.000000e+00> : vector<8x8xf32>
    %180 = tpu.matmul %178, %179, %cst_67 {dimension_numbers = #tpu.dot_dimension_numbers<[1], [0], [0], [1], [0, 0, 1, 1], [], []>} : vector<8x8xf32>, vector<8x8xf32>, vector<8x8xf32> -> vector<8x8xf32>
    %181 = vector.extract_strided_slice %14 {offsets = [16, 0], sizes = [8, 32], strides = [1, 1]} : vector<32x32xf32> to vector<8x32xf32>
    %cst_68 = arith.constant dense<0.000000e+00> : vector<8x32xf32>
    %182 = tpu.matmul %180, %181, %cst_68 {dimension_numbers = #tpu.dot_dimension_numbers<[1], [0], [0], [1], [0, 0, 1, 1], [], []>} : vector<8x8xf32>, vector<8x32xf32>, vector<8x32xf32> -> vector<8x32xf32>
    %183 = arith.addf %162, %182 : vector<8x32xf32>
    %184 = vector.extract_strided_slice %110 {offsets = [0, 24], sizes = [8, 8], strides = [1, 1]} : vector<8x32xf32> to vector<8x8xf32>
    %185 = vector.extract_strided_slice %111 {offsets = [0, 24], sizes = [8, 8], strides = [1, 1]} : vector<8x32xf32> to vector<8x8xf32>
    %cst_69 = arith.constant dense<0.000000e+00> : vector<8x8xf32>
    %186 = tpu.matmul %184, %185, %cst_69 {dimension_numbers = #tpu.dot_dimension_numbers<[1], [1], [0], [0], [0, 0, 1, 0], [], []>} : vector<8x8xf32>, vector<8x8xf32>, vector<8x8xf32> -> vector<8x8xf32>
    %cst_70 = arith.constant 0.353553385 : f32
    %187 = vector.broadcast %cst_70 : f32 to vector<8x8xf32>
    %188 = arith.mulf %186, %187 : vector<8x8xf32>
    %189 = arith.addf %188, %119 : vector<8x8xf32>
    %cst_71 = arith.constant dense<0xFF800000> : vector<8xf32>
    %190 = vector.multi_reduction <maximumf>, %189, %cst_71 [1] : vector<8x8xf32> to vector<8xf32>
    %191 = vector.shape_cast %190 : vector<8xf32> to vector<8x1xf32>
    %192 = vector.broadcast %191 : vector<8x1xf32> to vector<8x8xf32>
    %193 = arith.subf %189, %192 : vector<8x8xf32>
    %194 = math.exp %193 : vector<8x8xf32>
    %cst_72 = arith.constant dense<0.000000e+00> : vector<8xf32>
    %195 = vector.multi_reduction <add>, %194, %cst_72 [1] : vector<8x8xf32> to vector<8xf32>
    %196 = vector.shape_cast %195 : vector<8xf32> to vector<8x1xf32>
    %197 = tpu.reciprocal %196 {approx = true} : vector<8x1xf32> -> vector<8x1xf32>
    %198 = vector.broadcast %197 : vector<8x1xf32> to vector<8x8xf32>
    %199 = arith.mulf %194, %198 : vector<8x8xf32>
    %200 = vector.extract_strided_slice %112 {offsets = [0, 24], sizes = [8, 8], strides = [1, 1]} : vector<8x32xf32> to vector<8x8xf32>
    %cst_73 = arith.constant dense<0.000000e+00> : vector<8x8xf32>
    %201 = tpu.matmul %199, %200, %cst_73 {dimension_numbers = #tpu.dot_dimension_numbers<[1], [0], [0], [1], [0, 0, 1, 1], [], []>} : vector<8x8xf32>, vector<8x8xf32>, vector<8x8xf32> -> vector<8x8xf32>
    %202 = vector.extract_strided_slice %14 {offsets = [24, 0], sizes = [8, 32], strides = [1, 1]} : vector<32x32xf32> to vector<8x32xf32>
    %cst_74 = arith.constant dense<0.000000e+00> : vector<8x32xf32>
    %203 = tpu.matmul %201, %202, %cst_74 {dimension_numbers = #tpu.dot_dimension_numbers<[1], [0], [0], [1], [0, 0, 1, 1], [], []>} : vector<8x8xf32>, vector<8x32xf32>, vector<8x32xf32> -> vector<8x32xf32>
    %204 = arith.addf %183, %203 : vector<8x32xf32>
    %205 = tpu.concatenate %109, %204 in 0 : vector<8x32xf32>, vector<8x32xf32> -> vector<16x32xf32>
    %c0_75 = arith.constant 0 : index
    %c0_76 = arith.constant 0 : index
    %206 = vector.load %arg9[%c0_75, %c0_76] : memref<1x32xf32, #tpu.memory_space<vmem>>, vector<1x32xf32>
    %207 = vector.broadcast %206 : vector<1x32xf32> to vector<16x32xf32>
    %208 = arith.addf %205, %207 : vector<16x32xf32>
    %209 = arith.addf %208, %0 : vector<16x32xf32>
    %c0_77 = arith.constant 0 : index
    %c0_78 = arith.constant 0 : index
    %210 = vector.load %arg10[%c0_77, %c0_78] : memref<1x32xf32, #tpu.memory_space<vmem>>, vector<1x32xf32>
    %c0_79 = arith.constant 0 : index
    %c0_80 = arith.constant 0 : index
    %211 = vector.load %arg11[%c0_79, %c0_80] : memref<1x32xf32, #tpu.memory_space<vmem>>, vector<1x32xf32>
    %cst_81 = arith.constant dense<0.000000e+00> : vector<16xf32>
    %212 = vector.multi_reduction <add>, %209, %cst_81 [1] : vector<16x32xf32> to vector<16xf32>
    %213 = vector.shape_cast %212 : vector<16xf32> to vector<16x1xf32>
    %cst_82 = arith.constant 3.200000e+01 : f32
    %214 = vector.broadcast %cst_82 : f32 to vector<16x1xf32>
    %215 = arith.divf %213, %214 : vector<16x1xf32>
    %216 = vector.broadcast %215 : vector<16x1xf32> to vector<16x32xf32>
    %217 = arith.subf %209, %216 : vector<16x32xf32>
    %218 = arith.mulf %217, %217 : vector<16x32xf32>
    %cst_83 = arith.constant dense<0.000000e+00> : vector<16xf32>
    %219 = vector.multi_reduction <add>, %218, %cst_83 [1] : vector<16x32xf32> to vector<16xf32>
    %220 = vector.shape_cast %219 : vector<16xf32> to vector<16x1xf32>
    %cst_84 = arith.constant 3.200000e+01 : f32
    %221 = vector.broadcast %cst_84 : f32 to vector<16x1xf32>
    %222 = arith.divf %220, %221 : vector<16x1xf32>
    %223 = vector.broadcast %215 : vector<16x1xf32> to vector<16x32xf32>
    %224 = arith.subf %209, %223 : vector<16x32xf32>
    %cst_85 = arith.constant 9.99999997E-7 : f32
    %225 = vector.broadcast %cst_85 : f32 to vector<16x1xf32>
    %226 = arith.addf %222, %225 : vector<16x1xf32>
    %227 = math.rsqrt %226 : vector<16x1xf32>
    %228 = vector.broadcast %227 : vector<16x1xf32> to vector<16x32xf32>
    %229 = arith.mulf %224, %228 : vector<16x32xf32>
    %230 = vector.broadcast %210 : vector<1x32xf32> to vector<16x32xf32>
    %231 = arith.mulf %229, %230 : vector<16x32xf32>
    %232 = vector.broadcast %211 : vector<1x32xf32> to vector<16x32xf32>
    %233 = arith.addf %231, %232 : vector<16x32xf32>
    %c0_86 = arith.constant 0 : index
    %c0_87 = arith.constant 0 : index
    %234 = vector.load %arg12[%c0_86, %c0_87] : memref<32x64xf32, #tpu.memory_space<vmem>>, vector<32x64xf32>
    %cst_88 = arith.constant dense<0.000000e+00> : vector<16x64xf32>
    %235 = tpu.matmul %233, %234, %cst_88 {dimension_numbers = #tpu.dot_dimension_numbers<[1], [0], [0], [1], [0, 0, 1, 1], [], []>} : vector<16x32xf32>, vector<32x64xf32>, vector<16x64xf32> -> vector<16x64xf32>
    %c0_89 = arith.constant 0 : index
    %c0_90 = arith.constant 0 : index
    %236 = vector.load %arg13[%c0_89, %c0_90] : memref<1x64xf32, #tpu.memory_space<vmem>>, vector<1x64xf32>
    %237 = vector.broadcast %236 : vector<1x64xf32> to vector<16x64xf32>
    %238 = arith.addf %235, %237 : vector<16x64xf32>
    %cst_91 = arith.constant 0.000000e+00 : f32
    %239 = vector.broadcast %cst_91 : f32 to vector<16x64xf32>
    %240 = arith.maximumf %238, %239 : vector<16x64xf32>
    %c0_92 = arith.constant 0 : index
    %c0_93 = arith.constant 0 : index
    %241 = vector.load %arg14[%c0_92, %c0_93] : memref<64x32xf32, #tpu.memory_space<vmem>>, vector<64x32xf32>
    %cst_94 = arith.constant dense<0.000000e+00> : vector<16x32xf32>
    %242 = tpu.matmul %240, %241, %cst_94 {dimension_numbers = #tpu.dot_dimension_numbers<[1], [0], [0], [1], [0, 0, 1, 1], [], []>} : vector<16x64xf32>, vector<64x32xf32>, vector<16x32xf32> -> vector<16x32xf32>
    %c0_95 = arith.constant 0 : index
    %c0_96 = arith.constant 0 : index
    %243 = vector.load %arg15[%c0_95, %c0_96] : memref<1x32xf32, #tpu.memory_space<vmem>>, vector<1x32xf32>
    %244 = vector.broadcast %243 : vector<1x32xf32> to vector<16x32xf32>
    %245 = arith.addf %242, %244 : vector<16x32xf32>
    %246 = arith.addf %245, %233 : vector<16x32xf32>
    %c0_97 = arith.constant 0 : index
    %c0_98 = arith.constant 0 : index
    %247 = vector.load %arg16[%c0_97, %c0_98] : memref<1x32xf32, #tpu.memory_space<vmem>>, vector<1x32xf32>
    %c0_99 = arith.constant 0 : index
    %c0_100 = arith.constant 0 : index
    %248 = vector.load %arg17[%c0_99, %c0_100] : memref<1x32xf32, #tpu.memory_space<vmem>>, vector<1x32xf32>
    %cst_101 = arith.constant dense<0.000000e+00> : vector<16xf32>
    %249 = vector.multi_reduction <add>, %246, %cst_101 [1] : vector<16x32xf32> to vector<16xf32>
    %250 = vector.shape_cast %249 : vector<16xf32> to vector<16x1xf32>
    %cst_102 = arith.constant 3.200000e+01 : f32
    %251 = vector.broadcast %cst_102 : f32 to vector<16x1xf32>
    %252 = arith.divf %250, %251 : vector<16x1xf32>
    %253 = vector.broadcast %252 : vector<16x1xf32> to vector<16x32xf32>
    %254 = arith.subf %246, %253 : vector<16x32xf32>
    %255 = arith.mulf %254, %254 : vector<16x32xf32>
    %cst_103 = arith.constant dense<0.000000e+00> : vector<16xf32>
    %256 = vector.multi_reduction <add>, %255, %cst_103 [1] : vector<16x32xf32> to vector<16xf32>
    %257 = vector.shape_cast %256 : vector<16xf32> to vector<16x1xf32>
    %cst_104 = arith.constant 3.200000e+01 : f32
    %258 = vector.broadcast %cst_104 : f32 to vector<16x1xf32>
    %259 = arith.divf %257, %258 : vector<16x1xf32>
    %260 = vector.broadcast %252 : vector<16x1xf32> to vector<16x32xf32>
    %261 = arith.subf %246, %260 : vector<16x32xf32>
    %cst_105 = arith.constant 9.99999997E-7 : f32
    %262 = vector.broadcast %cst_105 : f32 to vector<16x1xf32>
    %263 = arith.addf %259, %262 : vector<16x1xf32>
    %264 = math.rsqrt %263 : vector<16x1xf32>
    %265 = vector.broadcast %264 : vector<16x1xf32> to vector<16x32xf32>
    %266 = arith.mulf %261, %265 : vector<16x32xf32>
    %267 = vector.broadcast %247 : vector<1x32xf32> to vector<16x32xf32>
    %268 = arith.mulf %266, %267 : vector<16x32xf32>
    %269 = vector.broadcast %248 : vector<1x32xf32> to vector<16x32xf32>
    %270 = arith.addf %268, %269 : vector<16x32xf32>
    %c0_106 = arith.constant 0 : index
    %c0_107 = arith.constant 0 : index
    %271 = vector.load %arg18[%c0_106, %c0_107] : memref<16x32xf32, #tpu.memory_space<vmem>>, vector<16x32xf32>
    tpu.vector_store %arg18[%c0_106, %c0_107], %270 {strides = array<i32>} : memref<16x32xf32, #tpu.memory_space<vmem>>, vector<16x32xf32>,
    return
  }
  func.func @transform_0(%arg0: i32) -> (i32, i32) {
    %c0_i32 = arith.constant 0 : i32
    %c0_i32_0 = arith.constant 0 : i32
    return %arg0, %c0_i32 : i32, i32
  }
  func.func @transform_1(%arg0: i32) -> (i32, i32) {
    %c0_i32 = arith.constant 0 : i32
    %c0_i32_0 = arith.constant 0 : i32
    return %arg0, %c0_i32 : i32, i32
  }
  func.func @transform_2(%arg0: i32) -> (i32, i32, i32) {
    %c0_i32 = arith.constant 0 : i32
    %c0_i32_0 = arith.constant 0 : i32
    %c0_i32_1 = arith.constant 0 : i32
    return %arg0, %c0_i32, %c0_i32_0 : i32, i32, i32
  }
  func.func @transform_3(%arg0: i32) -> (i32, i32) {
    %c0_i32 = arith.constant 0 : i32
    %c0_i32_0 = arith.constant 0 : i32
    %c0_i32_1 = arith.constant 0 : i32
    return %c0_i32, %c0_i32_0 : i32, i32
  }
  func.func @transform_4(%arg0: i32) -> (i32, i32) {
    %c0_i32 = arith.constant 0 : i32
    %c0_i32_0 = arith.constant 0 : i32
    %c0_i32_1 = arith.constant 0 : i32
    return %c0_i32, %c0_i32_0 : i32, i32
  }
  func.func @transform_5(%arg0: i32) -> (i32, i32) {
    %c0_i32 = arith.constant 0 : i32
    %c0_i32_0 = arith.constant 0 : i32
    %c0_i32_1 = arith.constant 0 : i32
    return %c0_i32, %c0_i32_0 : i32, i32
  }
  func.func @transform_6(%arg0: i32) -> (i32, i32) {
    %c0_i32 = arith.constant 0 : i32
    %c0_i32_0 = arith.constant 0 : i32
    %c0_i32_1 = arith.constant 0 : i32
    return %c0_i32, %c0_i32_0 : i32, i32
  }
  func.func @transform_7(%arg0: i32) -> (i32, i32) {
    %c0_i32 = arith.constant 0 : i32
    %c0_i32_0 = arith.constant 0 : i32
    %c0_i32_1 = arith.constant 0 : i32
    return %c0_i32, %c0_i32_0 : i32, i32
  }
  func.func @transform_8(%arg0: i32) -> (i32, i32) {
    %c0_i32 = arith.constant 0 : i32
    %c0_i32_0 = arith.constant 0 : i32
    %c0_i32_1 = arith.constant 0 : i32
    return %c0_i32, %c0_i32_0 : i32, i32
  }
  func.func @transform_9(%arg0: i32) -> (i32, i32) {
    %c0_i32 = arith.constant 0 : i32
    %c0_i32_0 = arith.constant 0 : i32
    %c0_i32_1 = arith.constant 0 : i32
    return %c0_i32, %c0_i32_0 : i32, i32
  }
  func.func @transform_10(%arg0: i32) -> (i32, i32) {
    %c0_i32 = arith.constant 0 : i32
    %c0_i32_0 = arith.constant 0 : i32
    %c0_i32_1 = arith.constant 0 : i32
    return %c0_i32, %c0_i32_0 : i32, i32
  }
  func.func @transform_11(%arg0: i32) -> (i32, i32) {
    %c0_i32 = arith.constant 0 : i32
    %c0_i32_0 = arith.constant 0 : i32
    %c0_i32_1 = arith.constant 0 : i32
    return %c0_i32, %c0_i32_0 : i32, i32
  }
  func.func @transform_12(%arg0: i32) -> (i32, i32) {
    %c0_i32 = arith.constant 0 : i32
    %c0_i32_0 = arith.constant 0 : i32
    %c0_i32_1 = arith.constant 0 : i32
    return %c0_i32, %c0_i32_0 : i32, i32
  }
  func.func @transform_13(%arg0: i32) -> (i32, i32) {
    %c0_i32 = arith.constant 0 : i32
    %c0_i32_0 = arith.constant 0 : i32
    %c0_i32_1 = arith.constant 0 : i32
    return %c0_i32, %c0_i32_0 : i32, i32
  }
  func.func @transform_14(%arg0: i32) -> (i32, i32) {
    %c0_i32 = arith.constant 0 : i32
    %c0_i32_0 = arith.constant 0 : i32
    %c0_i32_1 = arith.constant 0 : i32
    return %c0_i32, %c0_i32_0 : i32, i32
  }
  func.func @transform_15(%arg0: i32) -> (i32, i32) {
    %c0_i32 = arith.constant 0 : i32
    %c0_i32_0 = arith.constant 0 : i32
    %c0_i32_1 = arith.constant 0 : i32
    return %c0_i32, %c0_i32_0 : i32, i32
  }
  func.func @transform_16(%arg0: i32) -> (i32, i32) {
    %c0_i32 = arith.constant 0 : i32
    %c0_i32_0 = arith.constant 0 : i32
    %c0_i32_1 = arith.constant 0 : i32
    return %c0_i32, %c0_i32_0 : i32, i32
  }
  func.func @transform_17(%arg0: i32) -> (i32, i32) {
    %c0_i32 = arith.constant 0 : i32
    %c0_i32_0 = arith.constant 0 : i32
    return %arg0, %c0_i32 : i32, i32
  }
}

</mosaic_0001>

<bundles_post_ra>
// kernel: decoder_layer.1
= control target key start
LH: loop header
LB: loop body
LE: loop exit
PB: predicated region body
PF: predicated region fallthrough
CT: control target
= control target key end

     0   :  { %s1629_s0 = inlined_call_operand.vmem [shape: f32[16,32], index: 0, kind: input, shape index: {}]   ;;  %s1630_s1 = inlined_call_operand.vmem [shape: f32[16,32], index: 1, kind: input, shape index: {}]   ;;  %s1631_s2 = inlined_call_operand.vmem [shape: f32[2,8,8], index: 2, kind: input, shape index: {}]   ;;  %s1632_s3 = inlined_call_operand.vmem [shape: f32[32,32], index: 3, kind: input, shape index: {}]   ;;  %s1633_s4 = inlined_call_operand.vmem [shape: f32[1,32], index: 4, kind: input, shape index: {}]   ;;  %s1634_s5 = inlined_call_operand.vmem [shape: f32[32,64], index: 5, kind: input, shape index: {}]   ;;  %s1635_s6 = inlined_call_operand.vmem [shape: f32[1,64], index: 6, kind: input, shape index: {}]   ;;  %s1636_s7 = inlined_call_operand.vmem [shape: f32[32,32], index: 7, kind: input, shape index: {}]   ;;  %s1637_s8 = inlined_call_operand.vmem [shape: f32[1,32], index: 8, kind: input, shape index: {}]   ;;  %s1638_s9 = inlined_call_operand.vmem [shape: f32[1,32], index: 9, kind: input, shape index: {}]   ;;  %s1639_s10 = inlined_call_operand.vmem [shape: f32[1,32], index: 10, kind: input, shape index: {}]   ;;  %s1640_s11 = inlined_call_operand.vmem [shape: f32[32,64], index: 11, kind: input, shape index: {}]   ;;  %s1641_s12 = inlined_call_operand.vmem [shape: f32[1,64], index: 12, kind: input, shape index: {}]   ;;  %s1642_s13 = inlined_call_operand.vmem [shape: f32[64,32], index: 13, kind: input, shape index: {}]   ;;  %s1643_s14 = inlined_call_operand.vmem [shape: f32[1,32], index: 14, kind: input, shape index: {}]   ;;  %s1644_s15 = inlined_call_operand.vmem [shape: f32[1,32], index: 15, kind: input, shape index: {}]   ;;  %s1645_s16 = inlined_call_operand.vmem [shape: f32[1,32], index: 16, kind: input, shape index: {}]   ;;  %s1646_s17 = inlined_call_operand.hbm [shape: f32[16,32], index: 17, kind: output, shape index: {}]  }
   0x1   :  { %1649 = sst [smem:[#allocation5_spill]] %s1629_s0 }
   0x2   :  { %1650 = sst [smem:[#allocation6_spill]] %s1630_s1 }
   0x3   :  { %v64_v0 = vld [vmem:[%s1632_s3 + $0x18] sm:$0xff]  ;;  %v63_v2 = vld [vmem:[%s1632_s3 + $0x10] sm:$0xff]  ;;  %v62_v4 = vld [vmem:[%s1632_s3 + $0x8] sm:$0xff]  ;;  %s1651_s27 = sld [smem:[#allocation5_spill]]  ;;  %vm69_vm0 = vcmask 261120  }
   0x4   :  { %v102_v1 = vld [vmem:[%s1634_s5 + $0x18] sm:$0xff]  ;;  %88 = vmatpush.msra.mxu0 %v64_v0  ;;  %v101_v3 = vld [vmem:[%s1634_s5 + $0x10] sm:$0xff]  ;;  %v100_v5 = vld [vmem:[%s1634_s5 + $0x8] sm:$0xff]  ;;  %s1652_s0 = sld [smem:[#allocation6_spill]] }
   0x5   :  { %125 = vmatpush.msra.mxu1 %v102_v1  ;;  %v61_v6 = vld [vmem:[%s1632_s3] sm:$0xff] }
   0x6   :  { %89 = vmatpush.msra.mxu0 %v63_v2  ;;  %v99_v7 = vld [vmem:[%s1634_s5] sm:$0xff] }
   0x7   :  { %126 = vmatpush.msra.mxu1 %v101_v3 }
   0x8   :  { %90 = vmatpush.msra.mxu0 %v62_v4 }
   0x9   :  { %v1357_v8 = vld [vmem:[%s1651_s27] sm:$0xff]  ;;  %127 = vmatpush.msra.mxu1 %v100_v5 }
   0xa   :  { %v59_v9 = vld [vmem:[%s1652_s0] sm:$0xff]  ;;  %91 = vmatpush.msra.mxu0 %v61_v6 }
   0xb   :  { %128 = vmatpush.msra.mxu1 %v99_v7 }
   0xc   :  { %22 = vsyncpa [#allocation3], 0  ;;  %1098 = vmatmul.msk.f32.vlgmr.msra.gmra.mxu0 %vm69_vm0, %v1357_v8  ;;  %1100 = vmatmul.msk.f32.vlgmr.msra.gmra.mxu1 %vm69_vm0, %v59_v9  ;;  %v1368_v10 = vld [vmem:[%s1651_s27 + $0x8] sm:$0xff]  ;;  %v1375_v11 = vld [vmem:[%s1633_s4] ss:$0 sm:$0xff]  ;;  %vm143_vm1 = vcmask 64512  }
   0xd   :  { %v1380_v12 = vld [vmem:[%s1635_s6] ss:$0 sm:$0xff]  ;;  %s1228_s20 = smov 96   ;;  %s1229_s4 = smov 120   ;;  %v1231_v24 = vmov -1e+09  }
   0xe   :  { %s1230_s6 = smov 112   ;;  %v140_v22 = vld [vmem:[%s1631_s2] sm:$0xff]  ;;  %s1232_s25 = smov 88   ;;  %v60_v53 = vld [vmem:[%s1652_s0 + $0x8] sm:$0xff]  ;;  %v138_v9 = vld [vmem:[%s1636_s7 + $0x10] sm:$0xff]  ;;  %vm990_vm8 = vcmask 523264  }
   0xf   :  { %vm141_vm2 = vcmp.gt.f32.partialorder %v140_v22, 0.0  ;;  %v1416_v38 = vld [vmem:[%s1636_s7] sm:$0xff]  ;;  %s1233_s26 = smov 104   ;;  %s1234_s29 = smov 80   ;;  %v137_v60 = vld [vmem:[%s1636_s7 + $0x8] sm:$0xff] }
  0x10   :  { %v1404_v25 = vsel %vm141_vm2, 0.0, %v1231_v24  ;;  %317 = vmatpush.msra.mxu2 %v1416_v38  ;;  %s1239_s0 = smov 8  }
  0x14   :  { %1099 = vmatmul.msk.f32.gmra.mxu0 %vm69_vm0, %v1368_v10  ;;  %1101 = vmatmul.msk.f32.gmra.mxu1 %vm69_vm0, %v60_v53 }
  0x89   :  { %v93_v13 = vpop.f32.mrf.mxu0  ;;  %v130_v14 = vpop.f32.mrf.mxu1 }
  0x8a   :  { %v94_v15 = vadd.f32 %v1375_v11, %v93_v13  ;;  %v1384_v16 = vadd.f32 %v1380_v12, %v130_v14 }
  0x8c   :  { %183 = vrot.lane.b32.xlu1 %v1384_v16, %s1228_s20  ;;  %1102 = vmatpush.xpose.msk.msrb.mxu0 %vm143_vm1, %v1384_v16 }
  0x8d   :  { %209 = vrot.lane.b32.xlu2 %v94_v15, %s1229_s4 }
  0x8f   :  { %1103 = vmatmul.msk.f32.vlgmr.msrb.gmra.mxu0 %vm143_vm1, %v94_v15 }
  0x91   :  { %v1397_v20 = vpop.f32.mrf.mxu0  ;;  %v133_v62 = vpop.f32.mrf.mxu1 }
  0x92   :  { %v1441_v0 = vadd.f32 %v1380_v12, %v133_v62 }
  0x94   :  { %211 = vrot.lane.b32.xlu1 %v1384_v16, %s1229_s4 }
  0x95   :  { %324 = vrot.lane.b32.xlu2 %v1384_v16, %s1230_s6 }
  0xe7   :  { %v210_v17 = vpop.permute.xlu2 %209 }
  0xef   :  { %v325_v18 = vpop.permute.xlu2 %324 }
  0xf0   :  { %1110 = vmatpush.xpose.msk.msra.mxu0 %vm143_vm1, %v325_v18 }
  0xfe   :  { %v184_v19 = vpop.permute.xlu1 %183 }
  0xff   :  { %204 = vmatpush.msra.mxu3 %v184_v19 }
 0x106   :  { %v212_v21 = vpop.permute.xlu1 %211 }
 0x107   :  { %1105 = vmatpush.xpose.msk.msrb.mxu3 %vm143_vm1, %v212_v21 }
 0x10c   :  { %v167_v23 = vpop.f32.mrf.mxu0 }
 0x10d   :  { %v170_v26 = vmul.f32 0.35355338, %v167_v23 }
 0x10f   :  { %v171_v27 = vadd.f32 %v170_v26, %v1404_v25 }
 0x111   :  { %v172_v28 = vsel %vm143_vm1, %v171_v27, -inf }
 0x112   :  { %173 = vmax.xlane.f32.xlu0 %v172_v28 }
 0x185   :  { %v174_v29 = vpop.xlane.xlu0 %173 }
 0x186   :  { %v175_v30 = vsub.f32 %v171_v27, %v174_v29 }
 0x188   :  { %v176_v31 = vmul.f32 1.442695, %v175_v30 }
 0x18a   :  { %1160 = vpow2.f32 %v176_v31 }
 0x190   :  { %v1161_v32 = vpop.eup %1160 }
 0x191   :  { %v178_v33 = vsel %vm143_vm1, %v1161_v32, 0.0 }
 0x192   :  { %179 = vadd.xlane.f32.xlu0 %v178_v33 }
 0x1a6   :  { %322 = vrot.lane.b32.xlu0 %v94_v15, %s1230_s6 }
 0x205   :  { %v180_v34 = vpop.xlane.xlu0 %179 }
 0x206   :  { %1162 = vrcp.f32 %v180_v34 }
 0x20c   :  { %v1163_v35 = vpop.eup %1162 }
 0x20d   :  { %v182_v36 = vmul.f32 %v1163_v35, %v1161_v32 }
 0x20f   :  { %1104 = vmatmul.msk.f32.vlgmr.msra.gmra.mxu3 %vm143_vm1, %v182_v36 }
 0x210   :  { %294 = vmatpush.msra.mxu3 %v137_v60 }
 0x217   :  { %1106 = vmatmul.msk.f32.vlgmr.msrb.gmra.mxu3 %vm143_vm1, %v210_v17 }
 0x218   :  { %v323_v37 = vpop.permute.xlu0 %322  ;;  %407 = vmatpush.msrb.mxu3 %v138_v9 }
 0x219   :  { %1111 = vmatmul.msk.f32.vlgmr.msra.gmra.mxu0 %vm143_vm1, %v323_v37 }
 0x292   :  { %v206_v39 = vpop.f32.mrf.mxu3 }
 0x293   :  { %1109 = vmatmul.msk.f32.vlgmr.msra.gmra.mxu2 %vm143_vm1, %v206_v39 }
 0x296   :  { %v347_v40 = vpop.f32.mrf.mxu0 }
 0x297   :  { %v350_v41 = vmul.f32 0.35355338, %v347_v40 }
 0x299   :  { %v351_v42 = vadd.f32 %v350_v41, %v1404_v25 }
 0x29a   :  { %v234_v43 = vpop.f32.mrf.mxu3 }
 0x29b   :  { %v237_v44 = vmul.f32 0.35355338, %v234_v43  ;;  %v352_v45 = vsel %vm143_vm1, %v351_v42, -inf }
 0x29c   :  { %353 = vmax.xlane.f32.xlu2 %v352_v45 }
 0x29d   :  { %v238_v46 = vadd.f32 %v237_v44, %v1404_v25 }
 0x29f   :  { %v239_v47 = vsel %vm143_vm1, %v238_v46, -inf }
 0x2a0   :  { %240 = vmax.xlane.f32.xlu1 %v239_v47 }
 0x2b9   :  { %250 = vrot.lane.b32.xlu1 %v1384_v16, %s1232_s25 }
 0x2c1   :  { %413 = vrot.lane.b32.xlu1 %v94_v15, %s1233_s26  ;;  %v97_v15 = vadd.f32 %v1375_v11, %v1397_v20 }
 0x30f   :  { %v354_v48 = vpop.xlane.xlu2 %353 }
 0x310   :  { %v355_v49 = vsub.f32 %v351_v42, %v354_v48 }
 0x312   :  { %v356_v50 = vmul.f32 1.442695, %v355_v49 }
 0x313   :  { %v241_v51 = vpop.xlane.xlu1 %240 }
 0x314   :  { %1164 = vpow2.f32 %v356_v50  ;;  %v242_v52 = vsub.f32 %v238_v46, %v241_v51 }
 0x316   :  { %v243_v54 = vmul.f32 1.442695, %v242_v52  ;;  %v319_v14 = vpop.f32.mrf.mxu2  ;;  %v1495_v52 = vld [vmem:[%s1636_s7 + $0x18] sm:$0xff] }
 0x318   :  { %1166 = vpow2.f32 %v243_v54 }
 0x31a   :  { %v1165_v55 = vpop.eup %1164 }
 0x31b   :  { %v358_v56 = vsel %vm143_vm1, %v1165_v55, 0.0 }
 0x31c   :  { %359 = vadd.xlane.f32.xlu2 %v358_v56 }
 0x31e   :  { %v1167_v57 = vpop.eup %1166 }
 0x31f   :  { %v245_v58 = vsel %vm143_vm1, %v1167_v57, 0.0 }
 0x320   :  { %246 = vadd.xlane.f32.xlu0 %v245_v58 }
 0x32b   :  { %v251_v59 = vpop.permute.xlu1 %250 }
 0x32c   :  { %271 = vmatpush.msrb.mxu1 %v251_v59 }
 0x333   :  { %v414_v7 = vpop.permute.xlu1 %413 }
 0x334   :  { %415 = vrot.lane.b32.xlu0 %v1384_v16, %s1233_s26  ;;  %363 = vrot.lane.b32.xlu2 %v1384_v16, %s1234_s29 }
 0x33c   :  { %547 = vrot.lane.b32.xlu0 %v1441_v0, %s1228_s20 }
 0x38f   :  { %v360_v61 = vpop.xlane.xlu2 %359 }
 0x393   :  { %v247_v63 = vpop.xlane.xlu0 %246 }
 0x394   :  { %1168 = vrcp.f32 %v247_v63 }
 0x395   :  { %1170 = vrcp.f32 %v360_v61 }
 0x397   :  { %v364_v1 = vpop.permute.xlu2 %363 }
 0x398   :  { %384 = vmatpush.msra.mxu1 %v364_v1 }
 0x39a   :  { %v1169_v2 = vpop.eup %1168 }
 0x39b   :  { %v249_v3 = vmul.f32 %v1169_v2, %v1167_v57  ;;  %v1171_v4 = vpop.eup %1170 }
 0x39c   :  { %v362_v5 = vmul.f32 %v1171_v4, %v1165_v55 }
 0x39d   :  { %1107 = vmatmul.msk.f32.vlgmr.msrb.gmra.mxu1 %vm143_vm1, %v249_v3 }
 0x39e   :  { %498 = vmatpush.msrb.mxu1 %v1495_v52 }
 0x3a5   :  { %1112 = vmatmul.msk.f32.vlgmr.msra.gmra.mxu1 %vm143_vm1, %v362_v5 }
 0x3a6   :  { %v416_v6 = vpop.permute.xlu0 %415 }
 0x3a7   :  { %1114 = vmatpush.xpose.msk.msrb.mxu2 %vm143_vm1, %v416_v6 }
 0x3aa   :  { %1115 = vmatmul.msk.f32.vlgmr.msrb.gmra.mxu2 %vm143_vm1, %v414_v7 }
 0x3ae   :  { %v548_v19 = vpop.permute.xlu0 %547 }
 0x3af   :  { %568 = vmatpush.msra.mxu2 %v548_v19 }
 0x3b1   :  { %681 = vmatpush.msrb.mxu2 %v1416_v38 }
 0x41a   :  { %v273_v12 = vpop.f32.mrf.mxu1 }
 0x41b   :  { %1108 = vmatmul.msk.f32.vlgmr.msra.gmra.mxu3 %vm143_vm1, %v273_v12 }
 0x41c   :  { %1119 = vmatpush.xpose.msk.msra.mxu3 %vm143_vm1, %v1441_v0 }
 0x422   :  { %v386_v13 = vpop.f32.mrf.mxu1 }
 0x423   :  { %1113 = vmatmul.msk.f32.vlgmr.msrb.gmra.mxu3 %vm143_vm1, %v386_v13 }
 0x424   :  { %658 = vmatpush.msrb.mxu3 %v137_v60 }
 0x42b   :  { %1120 = vmatmul.msk.f32.vlgmr.msra.gmra.mxu3 %vm143_vm1, %v97_v15 }
 0x42c   :  { %771 = vmatpush.msra.mxu3 %v138_v9 }
 0x42d   :  { %v438_v17 = vpop.f32.mrf.mxu2 }
 0x42e   :  { %v441_v18 = vmul.f32 0.35355338, %v438_v17 }
 0x430   :  { %v442_v21 = vadd.f32 %v441_v18, %v1404_v25  ;;  %v1118_v25 = vld [vmem:[%s1631_s2 + $0x8] sm:$0xff]  ;;  %s1235_s2 = smov 72  }
 0x431   :  { %vm506_vm3 = vcmp.gt.f32.partialorder %v1118_v25, 0.0 }
 0x432   :  { %v443_v22 = vsel %vm143_vm1, %v442_v21, -inf  ;;  %v1470_v31 = vsel %vm506_vm3, 0.0, %v1231_v24 }
 0x433   :  { %444 = vmax.xlane.f32.xlu0 %v443_v22 }
 0x447   :  { %573 = vrot.lane.b32.xlu0 %v97_v15, %s1229_s4 }
 0x44f   :  { %777 = vrot.lane.b32.xlu0 %v97_v15, %s1233_s26 }
 0x49e   :  { %v296_v23 = vpop.f32.mrf.mxu3 }
 0x49f   :  { %v320_v11 = vadd.f32 %v319_v14, %v296_v23  ;;  %v1519_v23 = vld [vmem:[%s1637_s8] ss:$0 sm:$0xff] }
 0x4a6   :  { %v409_v20 = vpop.f32.mrf.mxu3  ;;  %v445_v27 = vpop.xlane.xlu0 %444 }
 0x4a7   :  { %v1464_v26 = vadd.f32 %v409_v20, %v320_v11  ;;  %v446_v28 = vsub.f32 %v442_v21, %v445_v27 }
 0x4a9   :  { %v447_v29 = vmul.f32 1.442695, %v446_v28 }
 0x4ab   :  { %1172 = vpow2.f32 %v447_v29 }
 0x4ae   :  { %v531_v30 = vpop.f32.mrf.mxu3 }
 0x4af   :  { %v534_v32 = vmul.f32 0.35355338, %v531_v30 }
 0x4b1   :  { %v535_v33 = vadd.f32 %v534_v32, %v1470_v31  ;;  %v1173_v35 = vpop.eup %1172 }
 0x4b2   :  { %v449_v36 = vsel %vm143_vm1, %v1173_v35, 0.0 }
 0x4b3   :  { %v536_v34 = vsel %vm143_vm1, %v535_v33, -inf }
 0x4b4   :  { %537 = vmax.xlane.f32.xlu2 %v536_v34 }
 0x4b9   :  { %v574_v50 = vpop.permute.xlu0 %573 }
 0x4bc   :  { %450 = vadd.xlane.f32.xlu2 %v449_v36  ;;  %v1236_v36 = vmov 32.0  }
 0x4c1   :  { %v778_v54 = vpop.permute.xlu0 %777 }
 0x4d4   :  { %575 = vrot.lane.b32.xlu2 %v1441_v0, %s1229_s4 }
 0x4dc   :  { %779 = vrot.lane.b32.xlu2 %v1441_v0, %s1233_s26 }
 0x527   :  { %v538_v37 = vpop.xlane.xlu2 %537 }
 0x528   :  { %v539_v24 = vsub.f32 %v535_v33, %v538_v37 }
 0x52a   :  { %v540_v38 = vmul.f32 1.442695, %v539_v24 }
 0x52c   :  { %1174 = vpow2.f32 %v540_v38 }
 0x52f   :  { %v451_v41 = vpop.xlane.xlu2 %450 }
 0x532   :  { %v1175_v39 = vpop.eup %1174 }
 0x533   :  { %v542_v40 = vsel %vm143_vm1, %v1175_v39, 0.0 }
 0x534   :  { %543 = vadd.xlane.f32.xlu1 %v542_v40 }
 0x537   :  { %v576_v42 = vpop.permute.xlu2 %575 }
 0x53f   :  { %v780_v46 = vpop.permute.xlu2 %779 }
 0x54d   :  { %454 = vrot.lane.b32.xlu1 %v1384_v16, %s1235_s2 }
 0x555   :  { %688 = vrot.lane.b32.xlu1 %v1441_v0, %s1230_s6 }
 0x55d   :  { %686 = vrot.lane.b32.xlu1 %v97_v15, %s1230_s6 }
 0x5a7   :  { %v544_v43 = vpop.xlane.xlu1 %543 }
 0x5a8   :  { %1176 = vrcp.f32 %v544_v43 }
 0x5a9   :  { %1178 = vrcp.f32 %v451_v41 }
 0x5ae   :  { %v1177_v44 = vpop.eup %1176 }
 0x5af   :  { %v546_v45 = vmul.f32 %v1177_v44, %v1175_v39  ;;  %v1179_v47 = vpop.eup %1178 }
 0x5b0   :  { %v453_v48 = vmul.f32 %v1179_v47, %v1173_v35 }
 0x5b1   :  { %1121 = vmatmul.msk.f32.vlgmr.msra.gmra.mxu2 %vm143_vm1, %v546_v45 }
 0x5b2   :  { %1131 = vmatpush.xpose.msk.msra.mxu2 %vm143_vm1, %v780_v46 }
 0x5bf   :  { %v455_v16 = vpop.permute.xlu1 %454 }
 0x5c0   :  { %475 = vmatpush.msrb.mxu0 %v455_v16 }
 0x5c1   :  { %1116 = vmatmul.msk.f32.vlgmr.msrb.gmra.mxu0 %vm143_vm1, %v453_v48 }
 0x5c2   :  { %1122 = vmatpush.xpose.msk.msra.mxu0 %vm143_vm1, %v576_v42 }
 0x5c7   :  { %v689_v49 = vpop.permute.xlu1 %688 }
 0x5c8   :  { %1127 = vmatpush.xpose.msk.msrb.mxu0 %vm143_vm1, %v689_v49 }
 0x5c9   :  { %1123 = vmatmul.msk.f32.vlgmr.msra.gmra.mxu0 %vm143_vm1, %v574_v50 }
 0x5cf   :  { %v687_v51 = vpop.permute.xlu1 %686 }
 0x5d1   :  { %1128 = vmatmul.msk.f32.vlgmr.msrb.gmra.mxu0 %vm143_vm1, %v687_v51 }
 0x634   :  { %v570_v53 = vpop.f32.mrf.mxu2 }
 0x635   :  { %1126 = vmatmul.msk.f32.vlgmr.msrb.gmra.mxu2 %vm143_vm1, %v570_v53  ;;  %v942_v53 = vld [vmem:[%s1640_s11 + $0x18] sm:$0xff] }
 0x63d   :  { %1132 = vmatmul.msk.f32.vlgmr.msra.gmra.mxu2 %vm143_vm1, %v778_v54  ;;  %v941_v54 = vld [vmem:[%s1640_s11 + $0x10] sm:$0xff] }
 0x63e   :  { %v477_v55 = vpop.f32.mrf.mxu0 }
 0x63f   :  { %1117 = vmatmul.msk.f32.vlgmr.msrb.gmra.mxu1 %vm143_vm1, %v477_v55  ;;  %v940_v55 = vld [vmem:[%s1640_s11 + $0x8] sm:$0xff] }
 0x646   :  { %v598_v56 = vpop.f32.mrf.mxu0 }
 0x647   :  { %v601_v57 = vmul.f32 0.35355338, %v598_v56  ;;  %v939_v56 = vld [vmem:[%s1640_s11] sm:$0xff]  ;;  %s1086_s11 = sshll.u32 %s1646_s17, 4  ;;  %s1087_s11 = int_to_ptr.hbm [resolvable:$true] %s1086_s11 }
 0x649   :  { %v602_v58 = vadd.f32 %v601_v57, %v1470_v31 }
 0x64b   :  { %v603_v59 = vsel %vm143_vm1, %v602_v58, -inf }
 0x64c   :  { %604 = vmax.xlane.f32.xlu2 %v603_v59 }
 0x64e   :  { %v711_v60 = vpop.f32.mrf.mxu0 }
 0x64f   :  { %v714_v61 = vmul.f32 0.35355338, %v711_v60 }
 0x651   :  { %v715_v62 = vadd.f32 %v714_v61, %v1470_v31 }
 0x653   :  { %v716_v63 = vsel %vm143_vm1, %v715_v62, -inf }
 0x654   :  { %717 = vmax.xlane.f32.xlu1 %v716_v63 }
 0x6b8   :  { %v1505_v1 = vpop.f32.mrf.mxu2 }
 0x6bc   :  { %v500_v21 = vpop.f32.mrf.mxu1 }
 0x6bd   :  { %v503_v22 = vadd.f32 %v500_v21, %v1464_v26  ;;  %v980_v21 = vld [vmem:[%s1642_s13 + $0x10] sm:$0xff] }
 0x6bf   :  { %v605_v2 = vpop.xlane.xlu2 %604  ;;  %v872_v11 = vadd.f32 %v1519_v23, %v503_v22  ;;  %v979_v22 = vld [vmem:[%s1642_s13 + $0x8] sm:$0xff] }
 0x6c0   :  { %v606_v3 = vsub.f32 %v602_v58, %v605_v2  ;;  %v802_v4 = vpop.f32.mrf.mxu2 }
 0x6c1   :  { %v805_v5 = vmul.f32 0.35355338, %v802_v4  ;;  %v874_v20 = vadd.f32 %v872_v11, %v1357_v8  ;;  %v1553_v4 = vld [vmem:[%s1638_s9] ss:$0 sm:$0xff] }
 0x6c2   :  { %v607_v6 = vmul.f32 1.442695, %v606_v3  ;;  %v978_v11 = vld [vmem:[%s1642_s13] sm:$0xff] }
 0x6c3   :  { %v806_v7 = vadd.f32 %v805_v5, %v1470_v31  ;;  %v878_v27 = vsel %vm69_vm0, %v874_v20, 0.0 }
 0x6c4   :  { %1180 = vpow2.f32 %v607_v6 }
 0x6c5   :  { %v807_v9 = vsel %vm143_vm1, %v806_v7, -inf }
 0x6c6   :  { %808 = vmax.xlane.f32.xlu0 %v807_v9 }
 0x6c7   :  { %v718_v12 = vpop.xlane.xlu1 %717 }
 0x6c8   :  { %v719_v13 = vsub.f32 %v715_v62, %v718_v12 }
 0x6ca   :  { %v1181_v14 = vpop.eup %1180  ;;  %v720_v15 = vmul.f32 1.442695, %v719_v13 }
 0x6cb   :  { %v609_v17 = vsel %vm143_vm1, %v1181_v14, 0.0 }
 0x6cc   :  { %1182 = vpow2.f32 %v720_v15  ;;  %610 = vadd.xlane.f32.xlu2 %v609_v17  ;;  %v984_v15 = vld [vmem:[%s1642_s13 + $0x30] sm:$0xff]  ;;  %v983_v17 = vld [vmem:[%s1642_s13 + $0x28] sm:$0xff] }
 0x6d2   :  { %v1183_v18 = vpop.eup %1182 }
 0x6d3   :  { %v722_v19 = vsel %vm143_vm1, %v1183_v18, 0.0 }
 0x6d4   :  { %723 = vadd.xlane.f32.xlu1 %v722_v19  ;;  %v981_v19 = vld [vmem:[%s1642_s13 + $0x18] sm:$0xff] }
 0x6da   :  { %614 = vrot.lane.b32.xlu0 %v1441_v0, %s1232_s25 }
 0x6ed   :  { %727 = vrot.lane.b32.xlu1 %v1441_v0, %s1234_s29  ;;  %s1238_s29 = smov 128  }
 0x704   :  { %879 = vadd.xlane.f32.xlu0 %v878_v27 }
 0x739   :  { %v809_v25 = vpop.xlane.xlu0 %808 }
 0x73a   :  { %v810_v28 = vsub.f32 %v806_v7, %v809_v25  ;;  %v1558_v7 = vld [vmem:[%s1639_s10] ss:$0 sm:$0xff] }
 0x73b   :  { %v1591_v25 = vld [vmem:[%s1641_s12] ss:$0 sm:$0xff] }
 0x73c   :  { %v811_v29 = vmul.f32 1.442695, %v810_v28 }
 0x73e   :  { %1184 = vpow2.f32 %v811_v29 }
 0x73f   :  { %v611_v30 = vpop.xlane.xlu2 %610 }
 0x740   :  { %1186 = vrcp.f32 %v611_v30 }
 0x744   :  { %v1185_v31 = vpop.eup %1184 }
 0x745   :  { %v813_v26 = vsel %vm143_vm1, %v1185_v31, 0.0 }
 0x746   :  { %814 = vadd.xlane.f32.xlu2 %v813_v26  ;;  %v1187_v32 = vpop.eup %1186 }
 0x747   :  { %v613_v33 = vmul.f32 %v1187_v32, %v1181_v14  ;;  %v724_v8 = vpop.xlane.xlu1 %723  ;;  %v985_v14 = vld [vmem:[%s1642_s13 + $0x38] sm:$0xff] }
 0x748   :  { %1188 = vrcp.f32 %v724_v8  ;;  %1005 = vmatpush.msrb.mxu2 %v985_v14 }
 0x749   :  { %1190 = vrcp.f32 %v1236_v36 }
 0x74a   :  { %1006 = vmatpush.msrb.mxu2 %v984_v15 }
 0x74c   :  { %v615_v34 = vpop.permute.xlu0 %614  ;;  %1007 = vmatpush.msrb.mxu2 %v983_v17 }
 0x74d   :  { %635 = vmatpush.msra.mxu1 %v615_v34 }
 0x74e   :  { %1124 = vmatmul.msk.f32.vlgmr.msra.gmra.mxu1 %vm143_vm1, %v613_v33  ;;  %v1189_v35 = vpop.eup %1188 }
 0x74f   :  { %v726_v37 = vmul.f32 %v1189_v35, %v1183_v18  ;;  %v1191_v38 = vpop.eup %1190  ;;  %v982_v18 = vld [vmem:[%s1642_s13 + $0x20] sm:$0xff] }
 0x750   :  { %v885_v39 = vmul.f32 32.0, %v1191_v38  ;;  %vm889_vm4 = vweird.f32 %v1191_v38  ;;  %1008 = vmatpush.msrb.mxu2 %v982_v18 }
 0x752   :  { %v886_v40 = vsub.f32 1.0, %v885_v39  ;;  %1009 = vmatpush.msrb.mxu2 %v981_v19 }
 0x754   :  { %v887_v41 = vmul.f32 %v1191_v38, %v886_v40  ;;  %1010 = vmatpush.msrb.mxu2 %v980_v21 }
 0x756   :  { %v888_v42 = vadd.f32 %v1191_v38, %v887_v41  ;;  %1011 = vmatpush.msrb.mxu2 %v979_v22 }
 0x758   :  { %v1530_v43 = vsel %vm889_vm4, %v1191_v38, %v888_v42  ;;  %1012 = vmatpush.msrb.mxu2 %v978_v11 }
 0x75e   :  { %818 = vrot.lane.b32.xlu2 %v1441_v0, %s1235_s2 }
 0x75f   :  { %v728_v24 = vpop.permute.xlu1 %727 }
 0x760   :  { %748 = vmatpush.msrb.mxu1 %v728_v24  ;;  %v1157_v24 = vld [vmem:[%s1643_s14] ss:$0 sm:$0xff] }
 0x761   :  { %1129 = vmatmul.msk.f32.vlgmr.msrb.gmra.mxu1 %vm143_vm1, %v726_v37 }
 0x762   :  { %862 = vmatpush.msra.mxu1 %v1495_v52 }
 0x777   :  { %v880_v44 = vpop.xlane.xlu0 %879 }
 0x778   :  { %v891_v0 = vmul.f32 %v1530_v43, %v880_v44 }
 0x77a   :  { %v893_v45 = vsub.f32 %v874_v20, %v891_v0 }
 0x77c   :  { %v895_v46 = vmul.f32 %v893_v45, %v893_v45 }
 0x77e   :  { %v897_v47 = vsel %vm69_vm0, %v895_v46, 0.0 }
 0x787   :  { %898 = vadd.xlane.f32.xlu2 %v897_v47 }
 0x7b9   :  { %v815_v48 = vpop.xlane.xlu2 %814 }
 0x7ba   :  { %1192 = vrcp.f32 %v815_v48 }
 0x7c0   :  { %v1193_v16 = vpop.eup %1192 }
 0x7c1   :  { %v817_v49 = vmul.f32 %v1193_v16, %v1185_v31  ;;  %v819_v50 = vpop.permute.xlu2 %818 }
 0x7c2   :  { %839 = vmatpush.msra.mxu0 %v819_v50 }
 0x7c3   :  { %1133 = vmatmul.msk.f32.vlgmr.msra.gmra.mxu0 %vm143_vm1, %v817_v49 }
 0x7cb   :  { %v637_v51 = vpop.f32.mrf.mxu1 }
 0x7cc   :  { %1125 = vmatmul.msk.f32.vlgmr.msrb.gmra.mxu3 %vm143_vm1, %v637_v51 }
 0x7cd   :  { %965 = vmatpush.msrb.mxu3 %v942_v53 }
 0x7cf   :  { %966 = vmatpush.msrb.mxu3 %v941_v54 }
 0x7d1   :  { %967 = vmatpush.msrb.mxu3 %v940_v55 }
 0x7d3   :  { %968 = vmatpush.msrb.mxu3 %v939_v56 }
 0x7de   :  { %v750_v52 = vpop.f32.mrf.mxu1 }
 0x7df   :  { %1130 = vmatmul.msk.f32.vlgmr.msra.gmra.mxu3 %vm143_vm1, %v750_v52 }
 0x7fa   :  { %v899_v57 = vpop.xlane.xlu2 %898 }
 0x7fb   :  { %v903_v58 = vmul.f32 %v899_v57, %v1530_v43 }
 0x7fd   :  { %v905_v59 = vadd.f32 1e-06, %v903_v58 }
 0x7ff   :  { %1194 = vrsqrt.f32 %v905_v59  ;;  %vm913_vm6 = vweird.f32 %v905_v59 }
 0x805   :  { %v1195_v60 = vpop.eup %1194 }
 0x806   :  { %v908_v61 = vmul.f32 %v1195_v60, %v905_v59  ;;  %vm914_vm5 = vweird.f32 %v1195_v60 }
 0x807   :  { %vm915_vm7 = vmor %vm913_vm6, %vm914_vm5 }
 0x808   :  { %v909_v62 = vmul.f32 %v1195_v60, %v908_v61 }
 0x80a   :  { %v910_v63 = vmul.f32 0.5, %v909_v62 }
 0x80c   :  { %v911_v2 = vsub.f32 1.5, %v910_v63 }
 0x80e   :  { %v912_v3 = vmul.f32 %v1195_v60, %v911_v2 }
 0x810   :  { %v916_v5 = vsel %vm915_vm7, %v1195_v60, %v912_v3 }
 0x811   :  { %v927_v6 = vmul.f32 %v916_v5, %v893_v45 }
 0x813   :  { %v932_v9 = vmul.f32 %v1553_v4, %v927_v6 }
 0x815   :  { %v937_v12 = vadd.f32 %v1558_v7, %v932_v9 }
 0x817   :  { %1135 = vmatmul.msk.f32.vlgmr.msrb.gmra.mxu3 %vm69_vm0, %v937_v12 }
 0x840   :  { %v841_v13 = vpop.f32.mrf.mxu0 }
 0x841   :  { %1134 = vmatmul.msk.f32.vlgmr.msra.gmra.mxu1 %vm143_vm1, %v841_v13 }
 0x84f   :  { %v660_v20 = vpop.f32.mrf.mxu3 }
 0x850   :  { %v684_v31 = vadd.f32 %v1505_v1, %v660_v20 }
 0x862   :  { %v773_v27 = vpop.f32.mrf.mxu3 }
 0x863   :  { %v776_v26 = vadd.f32 %v773_v27, %v684_v31 }
 0x89a   :  { %v970_v28 = vpop.f32.mrf.mxu3 }
 0x89b   :  { %v971_v29 = vadd.f32 %v1591_v25, %v970_v28 }
 0x89d   :  { %v976_v30 = vmax.f32 %v971_v29, 0.0 }
 0x89f   :  { %1137 = vmatmul.msk.f32.vlgmr.msrb.gmra.mxu2 %vm990_vm8, %v976_v30 }
 0x8be   :  { %v864_v32 = vpop.f32.mrf.mxu1 }
 0x8bf   :  { %v867_v33 = vadd.f32 %v864_v32, %v776_v26 }
 0x8c1   :  { %v873_v34 = vadd.f32 %v1519_v23, %v867_v33 }
 0x8c3   :  { %v875_v8 = vadd.f32 %v873_v34, %v1368_v10 }
 0x8c5   :  { %v881_v35 = vsel %vm69_vm0, %v875_v8, 0.0 }
 0x8c6   :  { %882 = vadd.xlane.f32.xlu1 %v881_v35 }
 0x922   :  { %v1014_v39 = vpop.f32.mrf.mxu2 }
 0x923   :  { %v1015_v40 = vadd.f32 %v1157_v24, %v1014_v39 }
 0x925   :  { %v1020_v23 = vadd.f32 %v1015_v40, %v937_v12  ;;  %v1159_v12 = vld [vmem:[%s1645_s16] ss:$0 sm:$0xff] }
 0x927   :  { %v1024_v10 = vsel %vm69_vm0, %v1020_v23, 0.0 }
 0x939   :  { %v883_v36 = vpop.xlane.xlu1 %882 }
 0x93a   :  { %v892_v37 = vmul.f32 %v1530_v43, %v883_v36 }
 0x93c   :  { %v894_v38 = vsub.f32 %v875_v8, %v892_v37 }
 0x93e   :  { %v896_v1 = vmul.f32 %v894_v38, %v894_v38 }
 0x940   :  { %v900_v41 = vsel %vm69_vm0, %v896_v1, 0.0 }
 0x941   :  { %901 = vadd.xlane.f32.xlu0 %v900_v41 }
 0x949   :  { %1025 = vadd.xlane.f32.xlu0 %v1024_v10 }
 0x9b4   :  { %v902_v42 = vpop.xlane.xlu0 %901 }
 0x9b5   :  { %v904_v44 = vmul.f32 %v902_v42, %v1530_v43 }
 0x9b7   :  { %v906_v0 = vadd.f32 1e-06, %v904_v44 }
 0x9b9   :  { %1196 = vrsqrt.f32 %v906_v0  ;;  %vm923_vm10 = vweird.f32 %v906_v0 }
 0x9bc   :  { %v1026_v45 = vpop.xlane.xlu0 %1025 }
 0x9bd   :  { %v1030_v46 = vmul.f32 %v1026_v45, %v1530_v43 }
 0x9bf   :  { %v1197_v47 = vpop.eup %1196  ;;  %v1032_v48 = vsub.f32 %v1020_v23, %v1030_v46 }
 0x9c0   :  { %v918_v16 = vmul.f32 %v1197_v47, %v906_v0  ;;  %vm924_vm9 = vweird.f32 %v1197_v47 }
 0x9c1   :  { %v1034_v49 = vmul.f32 %v1032_v48, %v1032_v48  ;;  %vm925_vm11 = vmor %vm923_vm10, %vm924_vm9 }
 0x9c2   :  { %v919_v50 = vmul.f32 %v1197_v47, %v918_v16 }
 0x9c3   :  { %v1036_v51 = vsel %vm69_vm0, %v1034_v49, 0.0 }
 0x9c4   :  { %v920_v52 = vmul.f32 0.5, %v919_v50  ;;  %1037 = vadd.xlane.f32.xlu2 %v1036_v51 }
 0x9c6   :  { %v921_v53 = vsub.f32 1.5, %v920_v52 }
 0x9c8   :  { %v922_v54 = vmul.f32 %v1197_v47, %v921_v53 }
 0x9ca   :  { %v926_v55 = vsel %vm925_vm11, %v1197_v47, %v922_v54 }
 0x9cb   :  { %v928_v56 = vmul.f32 %v926_v55, %v894_v38 }
 0x9cd   :  { %v933_v57 = vmul.f32 %v1553_v4, %v928_v56  ;;  %v1158_v4 = vld [vmem:[%s1644_s15] ss:$0 sm:$0xff]  ;;  %s1237_s15 = smov [#allocation2]  }
 0x9ce   :  { %s1084_s16 = sshll.u32 %s1237_s15, 4  ;;  %s1085_s16 = int_to_ptr.vmem [resolvable:$true] %s1084_s16 }
 0x9cf   :  { %v938_v58 = vadd.f32 %v1558_v7, %v933_v57 }
 0x9d1   :  { %1136 = vmatmul.msk.f32.gmra.mxu3 %vm69_vm0, %v938_v58 }
 0xa37   :  { %v1038_v59 = vpop.xlane.xlu2 %1037 }
 0xa38   :  { %v1042_v60 = vmul.f32 %v1038_v59, %v1530_v43 }
 0xa3a   :  { %v1044_v61 = vadd.f32 1e-06, %v1042_v60 }
 0xa3c   :  { %1198 = vrsqrt.f32 %v1044_v61  ;;  %vm1052_vm13 = vweird.f32 %v1044_v61 }
 0xa42   :  { %v1199_v62 = vpop.eup %1198 }
 0xa43   :  { %v1047_v63 = vmul.f32 %v1199_v62, %v1044_v61  ;;  %vm1053_vm12 = vweird.f32 %v1199_v62 }
 0xa44   :  { %vm1054_vm14 = vmor %vm1052_vm13, %vm1053_vm12 }
 0xa45   :  { %v1048_v2 = vmul.f32 %v1199_v62, %v1047_v63 }
 0xa47   :  { %v1049_v3 = vmul.f32 0.5, %v1048_v2 }
 0xa49   :  { %v1050_v5 = vsub.f32 1.5, %v1049_v3 }
 0xa4b   :  { %v1051_v6 = vmul.f32 %v1199_v62, %v1050_v5 }
 0xa4d   :  { %v1055_v7 = vsel %vm1054_vm14, %v1199_v62, %v1051_v6 }
 0xa4e   :  { %v1066_v9 = vmul.f32 %v1055_v7, %v1032_v48 }
 0xa50   :  { %v1071_v13 = vmul.f32 %v1158_v4, %v1066_v9 }
 0xa52   :  { %v1076_v14 = vadd.f32 %v1159_v12, %v1071_v13 }
 0xa54   :  { %v973_v15 = vpop.f32.mrf.mxu3  ;;  %1078 = vst.msk [vmem:[#allocation2] sm:$0xff] %vm69_vm0, %v1076_v14 }
 0xa55   :  { %v974_v17 = vadd.f32 %v1591_v25, %v973_v15 }
 0xa57   :  { %v977_v18 = vmax.f32 %v974_v17, 0.0 }
 0xa59   :  { %1138 = vmatmul.msk.f32.gmra.mxu2 %vm990_vm8, %v977_v18 }
 0xadc   :  { %v1017_v19 = vpop.f32.mrf.mxu2 }
 0xadd   :  { %v1018_v21 = vadd.f32 %v1157_v24, %v1017_v19 }
 0xadf   :  { %v1021_v22 = vadd.f32 %v1018_v21, %v938_v58 }
 0xae1   :  { %v1027_v11 = vsel %vm69_vm0, %v1021_v22, 0.0 }
 0xae2   :  { %1028 = vadd.xlane.f32.xlu1 %v1027_v11 }
 0xb55   :  { %v1029_v20 = vpop.xlane.xlu1 %1028 }
 0xb56   :  { %v1031_v27 = vmul.f32 %v1029_v20, %v1530_v43 }
 0xb58   :  { %v1033_v28 = vsub.f32 %v1021_v22, %v1031_v27 }
 0xb5a   :  { %v1035_v29 = vmul.f32 %v1033_v28, %v1033_v28 }
 0xb5c   :  { %v1039_v30 = vsel %vm69_vm0, %v1035_v29, 0.0 }
 0xb5d   :  { %1040 = vadd.xlane.f32.xlu0 %v1039_v30 }
 0xbd0   :  { %v1041_v31 = vpop.xlane.xlu0 %1040 }
 0xbd1   :  { %v1043_v25 = vmul.f32 %v1041_v31, %v1530_v43 }
 0xbd3   :  { %v1045_v26 = vadd.f32 1e-06, %v1043_v25 }
 0xbd5   :  { %1200 = vrsqrt.f32 %v1045_v26  ;;  %vm1062_vm1 = vweird.f32 %v1045_v26 }
 0xbdb   :  { %v1201_v32 = vpop.eup %1200 }
 0xbdc   :  { %v1057_v33 = vmul.f32 %v1201_v32, %v1045_v26  ;;  %vm1063_vm15 = vweird.f32 %v1201_v32 }
 0xbdd   :  { %vm1064_vm2 = vmor %vm1062_vm1, %vm1063_vm15 }
 0xbde   :  { %v1058_v34 = vmul.f32 %v1201_v32, %v1057_v33 }
 0xbe0   :  { %v1059_v8 = vmul.f32 0.5, %v1058_v34 }
 0xbe2   :  { %v1060_v35 = vsub.f32 1.5, %v1059_v8 }
 0xbe4   :  { %v1061_v36 = vmul.f32 %v1201_v32, %v1060_v35 }
 0xbe6   :  { %v1065_v37 = vsel %vm1064_vm2, %v1201_v32, %v1061_v36 }
 0xbe7   :  { %v1067_v24 = vmul.f32 %v1065_v37, %v1033_v28 }
 0xbe9   :  { %v1072_v43 = vmul.f32 %v1158_v4, %v1067_v24 }
 0xbeb   :  { %v1077_v38 = vadd.f32 %v1159_v12, %v1072_v43 }
 0xbed   :  { %1079 = vst.msk [vmem:[#allocation2 + $0x8] sm:$0xff] %vm69_vm0, %v1077_v38 }
 0xbee   :  { %1092 = dma.vmem_to_hbm [thread:$0]  %s1085_s16, 256, %s1087_s11, [#allocation3], %s1238_s29, %s1238_s29, %s1239_s0  }
 0xbef   :  { %1226 = dma.done.wait [#allocation3], 256  }
 0xbf0   :  { %1227 = vsyncadd [#allocation3], 4294967040 }
 0xbf1   :  { %1097 = vsyncpa [#allocation3], 1 }

</bundles_post_ra>
